<compile_context>
chip_gen: v7x
topology: tpu7x:2x2x1
jax: 0.10.0
libtpu: 0.0.40
codegen_flags: <defaults>
</compile_context>

<pallas_src>
import functools
import math

import jax
import jax.numpy as jnp
from jax.experimental import pallas as pl
from jax.experimental.pallas import tpu as pltpu

LN_EPS = 1e-12                  # LayerNorm eps used by the reference implementation
VMEM_LIMIT = 48 * 1024 * 1024   # above 16/32 MiB scoped defaults, below v7x physical 64 MiB

LAYER_PARAM_ORDER = [
    "wq1", "bq1", "wk1", "bk1", "wv1", "bv1", "wo1", "bo1", "g1", "be1",
    "wq2", "bq2", "wk2", "bk2", "wv2", "bv2", "wo2", "bo2", "g2", "be2",
    "wf1", "bf1", "wf2", "bf2", "g3", "be3",
]

# dot_general dimension numbers (batch dim = head, leading)
_DN_PROJ = (((2,), (1,)), ((0,), (0,)))   # [H,M,K] @ [H,K,N] -> [H,M,N]
_DN_QKT = (((2,), (2,)), ((0,), (0,)))    # [H,M,K] @ [H,N,K] -> [H,M,N]  (A @ B^T)


# ---------------------------------------------------------------------------
# In-kernel math helpers (traced inside the Pallas kernel body)
# ---------------------------------------------------------------------------
def _layernorm(x, gamma, beta):
    mu = jnp.mean(x, axis=-1, keepdims=True)
    xc = x - mu
    var = jnp.mean(jnp.square(xc), axis=-1, keepdims=True)
    return xc * jax.lax.rsqrt(var + LN_EPS) * gamma + beta


def _mha(q_in, kv_in, bias, wq3, bq3, wk3, bk3, wv3, bv3, wo3, bo, n_head):
    """Batched multi-head attention for one query tile.

    q_in: [Tq, D] f32, kv_in: [S, D] f32, bias: additive mask broadcastable to [Tq, S].
    wq3/wk3/wv3: [H, D, dh] bf16, bq3/bk3/bv3: [H, 1, dh] f32,
    wo3: [H, dh, D] bf16, bo: [1, D] f32.
    """
    n_q, d_model = q_in.shape
    n_kv = kv_in.shape[0]
    dh = d_model // n_head
    scale = 1.0 / math.sqrt(dh)

    # One batched projection per Q/K/V (single MXU instruction stream, no concat later).
    qb = jnp.broadcast_to(q_in.astype(jnp.bfloat16)[None], (n_head, n_q, d_model))
    kb = jnp.broadcast_to(kv_in.astype(jnp.bfloat16)[None], (n_head, n_kv, d_model))
    q = jax.lax.dot_general(qb, wq3, _DN_PROJ, preferred_element_type=jnp.float32) + bq3
    k = jax.lax.dot_general(kb, wk3, _DN_PROJ, preferred_element_type=jnp.float32) + bk3
    v = jax.lax.dot_general(kb, wv3, _DN_PROJ, preferred_element_type=jnp.float32) + bv3
    q = q * scale  # fold 1/sqrt(dh) into q once (Tq*dh mults, not Tq*S per head)

    # scores + additive mask bias, softmax kept in f32
    s = jax.lax.dot_general(q.astype(jnp.bfloat16), k.astype(jnp.bfloat16), _DN_QKT,
                            preferred_element_type=jnp.float32)           # [H, Tq, S]
    s = s + bias.astype(jnp.float32)[None]
    m = jnp.max(s, axis=-1, keepdims=True)
    p = jnp.exp(s - m)
    l = jnp.sum(p, axis=-1, keepdims=True)
    p = p * pl.reciprocal(l, approx=True)                                 # EUP reciprocal

    o = jax.lax.dot_general(p.astype(jnp.bfloat16), v.astype(jnp.bfloat16), _DN_PROJ,
                            preferred_element_type=jnp.float32)           # [H, Tq, dh]
    # per-head output projection, then reduce over heads (replaces the concat)
    out_h = jax.lax.dot_general(o.astype(jnp.bfloat16), wo3, _DN_PROJ,
                                preferred_element_type=jnp.float32)       # [H, Tq, D]
    return jnp.sum(out_h, axis=0) + bo


# ---------------------------------------------------------------------------
# Pallas kernels
# ---------------------------------------------------------------------------
def decoder_layer_kernel(xq_ref, xkv_ref, enc_ref, tbias_ref, sbias_ref,
                         wq1, bq1, wk1, bk1, wv1, bv1, wo1, bo1, g1, be1,
                         wq2, bq2, wk2, bk2, wv2, bv2, wo2, bo2, g2, be2,
                         wf1, bf1, wf2, bf2, g3, be3,
                         out_ref, *, n_head):
    xq = xq_ref[0]       # [Tq, D]  query / residual tile
    xkv = xkv_ref[0]     # [T, D]   full sequence (self-attn K/V)
    enc = enc_ref[0]     # [S, D]   encoder memory
    tb = tbias_ref[0]    # [Tq, T]  additive self-attn mask (bf16)
    sb = sbias_ref[0]    # [1, S]   additive cross-attn key mask (f32)

    # 1) masked self-attention + residual + layernorm
    y = _mha(xq, xkv, tb, wq1[...], bq1[...], wk1[...], bk1[...],
             wv1[...], bv1[...], wo1[...], bo1[...], n_head)
    x = _layernorm(y + xq, g1[...], be1[...])

    # 2) encoder-decoder attention + residual + layernorm
    y = _mha(x, enc, sb, wq2[...], bq2[...], wk2[...], bk2[...],
             wv2[...], bv2[...], wo2[...], bo2[...], n_head)
    x = _layernorm(y + x, g2[...], be2[...])

    # 3) position-wise feed-forward + residual + layernorm (bf16 matmuls, f32 accum)
    h = jnp.dot(x.astype(jnp.bfloat16), wf1[...],
                preferred_element_type=jnp.float32) + bf1[...]
    h = jnp.maximum(h, 0.0)
    y = jnp.dot(h.astype(jnp.bfloat16), wf2[...],
                preferred_element_type=jnp.float32) + bf2[...]
    x = _layernorm(y + x, g3[...], be3[...])

    out_ref[0] = x


def linear_kernel(x_ref, w_ref, b_ref, o_ref):
    o_ref[0] = (jnp.dot(x_ref[0].astype(jnp.bfloat16), w_ref[...],
                        preferred_element_type=jnp.float32) + b_ref[...])


# ---------------------------------------------------------------------------
# Wrappers around pallas_call
# ---------------------------------------------------------------------------
def _const_index_map(ndim):
    def imap(b, q):
        return (0,) * ndim
    return imap


def _const_spec(arr):
    return pl.BlockSpec(arr.shape, _const_index_map(arr.ndim))


def _pick_qtile(t):
    for c in (256, 128):
        if t >= c and t % c == 0:
            return c
    return t


def run_decoder_layer(x, enc, tbias, sbias, layer_params, n_head):
    B, T, D = x.shape
    S = enc.shape[1]
    tq = _pick_qtile(T)
    weights = [layer_params[k] for k in LAYER_PARAM_ORDER]
    in_specs = [
        pl.BlockSpec((1, tq, D), lambda b, q: (b, q, 0)),   # query / residual tile
        pl.BlockSpec((1, T, D), lambda b, q: (b, 0, 0)),    # full seq for self-attn K/V
        pl.BlockSpec((1, S, D), lambda b, q: (b, 0, 0)),    # encoder memory
        pl.BlockSpec((1, tq, T), lambda b, q: (b, q, 0)),   # self-attn bias (bf16)
        pl.BlockSpec((1, 1, S), lambda b, q: (b, 0, 0)),    # cross-attn key bias
    ] + [_const_spec(w) for w in weights]
    return pl.pallas_call(
        functools.partial(decoder_layer_kernel, n_head=n_head),
        out_shape=jax.ShapeDtypeStruct((B, T, D), jnp.float32),
        grid=(B, T // tq),
        in_specs=in_specs,
        out_specs=pl.BlockSpec((1, tq, D), lambda b, q: (b, q, 0)),
        compiler_params=pltpu.CompilerParams(
            dimension_semantics=("parallel", "parallel"),
            vmem_limit_bytes=VMEM_LIMIT),
    )(x, x, enc, tbias, sbias, *weights)


def run_final_linear(x, w, b):
    B, T, D = x.shape
    V = w.shape[1]
    tile_v = 512 if V >= 512 else 128          # lane-dense vocab tiles (multiple of 128)
    vp = pl.cdiv(V, tile_v) * tile_v
    if vp != V:                                # pad vocab dim so tiles divide evenly
        w = jnp.pad(w, ((0, 0), (0, vp - V)))
        b = jnp.pad(b, ((0, 0), (0, vp - V)))
    out = pl.pallas_call(
        linear_kernel,
        out_shape=jax.ShapeDtypeStruct((B, T, vp), jnp.float32),
        grid=(B, vp // tile_v),
        in_specs=[pl.BlockSpec((1, T, D), lambda i, j: (i, 0, 0)),
                  pl.BlockSpec((D, tile_v), lambda i, j: (0, j)),
                  pl.BlockSpec((1, tile_v), lambda i, j: (0, j))],
        out_specs=pl.BlockSpec((1, T, tile_v), lambda i, j: (i, j, 0)),
        compiler_params=pltpu.CompilerParams(
            dimension_semantics=("parallel", "parallel"),
            vmem_limit_bytes=VMEM_LIMIT),
    )(x, w, b)
    return out[:, :, :V]


# ---------------------------------------------------------------------------
# Parameter initialization (deterministic, synthetic)
# ---------------------------------------------------------------------------
def _positional_encoding(max_len, d_model):
    pos = jnp.arange(max_len, dtype=jnp.float32)[:, None]
    i2 = jnp.arange(0, d_model, 2, dtype=jnp.float32)
    angle = pos / jnp.power(10000.0, i2 / d_model)
    pe = jnp.zeros((max_len, d_model), dtype=jnp.float32)
    pe = pe.at[:, 0::2].set(jnp.sin(angle))
    pe = pe.at[:, 1::2].set(jnp.cos(angle))
    return pe


def init_decoder_params(key, dec_voc_size, max_len, d_model, ffn_hidden, n_head, n_layers):
    assert d_model % n_head == 0, "d_model must be divisible by n_head"
    dh = d_model // n_head
    keys = iter(jax.random.split(key, 2 + n_layers * 20))

    def dense(shape, scale=0.02):
        return scale * jax.random.normal(next(keys), shape, dtype=jnp.float32)

    def split_heads_in(w):   # [D, D] -> [H, D, dh]  (per-head output columns)
        return jnp.transpose(w.reshape(d_model, n_head, dh), (1, 0, 2)).astype(jnp.bfloat16)

    emb = dense((dec_voc_size, d_model), scale=1.0)
    emb = emb.at[1].set(0.0)  # nn.Embedding(padding_idx=1)

    layers = []
    for _ in range(n_layers):
        lp = {}
        for p in ("1", "2"):  # self-attn, cross-attn
            lp[f"wq{p}"] = split_heads_in(dense((d_model, d_model)))
            lp[f"bq{p}"] = jnp.zeros((n_head, 1, dh), jnp.float32)
            lp[f"wk{p}"] = split_heads_in(dense((d_model, d_model)))
            lp[f"bk{p}"] = jnp.zeros((n_head, 1, dh), jnp.float32)
            lp[f"wv{p}"] = split_heads_in(dense((d_model, d_model)))
            lp[f"bv{p}"] = jnp.zeros((n_head, 1, dh), jnp.float32)
            lp[f"wo{p}"] = dense((d_model, d_model)).reshape(
                n_head, dh, d_model).astype(jnp.bfloat16)     # [H, dh, D]
            lp[f"bo{p}"] = jnp.zeros((1, d_model), jnp.float32)
            lp[f"g{p}"] = jnp.ones((1, d_model), jnp.float32)
            lp[f"be{p}"] = jnp.zeros((1, d_model), jnp.float32)
        lp["wf1"] = dense((d_model, ffn_hidden)).astype(jnp.bfloat16)
        lp["bf1"] = jnp.zeros((1, ffn_hidden), jnp.float32)
        lp["wf2"] = dense((ffn_hidden, d_model)).astype(jnp.bfloat16)
        lp["bf2"] = jnp.zeros((1, d_model), jnp.float32)
        lp["g3"] = jnp.ones((1, d_model), jnp.float32)
        lp["be3"] = jnp.zeros((1, d_model), jnp.float32)
        layers.append(lp)

    lin_w = dense((d_model, dec_voc_size)).astype(jnp.bfloat16)
    lin_b = jnp.zeros((1, dec_voc_size), jnp.float32)

    return {
        "emb_table": emb,
        "pos_enc": _positional_encoding(max_len, d_model),
        "layers": layers,
        "lin_w": lin_w,
        "lin_b": lin_b,
    }


# ---------------------------------------------------------------------------
# Full Decoder forward
# ---------------------------------------------------------------------------
def decoder_forward(params, trg, enc_src, trg_mask, src_mask, n_head):
    B, T = trg.shape
    S = enc_src.shape[1]
    # TransformerEmbedding: token gather + sinusoidal positional encoding (plain JAX glue)
    x = (params["emb_table"][trg] + params["pos_enc"][:T][None, :, :]).astype(jnp.float32)
    enc_src = enc_src.astype(jnp.float32)

    # additive attention biases: 0 where attended, -10000 where masked (computed once)
    tbias = ((trg_mask[:, 0].astype(jnp.float32) - 1.0) * 10000.0).astype(jnp.bfloat16)  # [B,T,T]
    sbias = (src_mask[:, 0].astype(jnp.float32) - 1.0) * 10000.0                         # [B,1,S]

    for lp in params["layers"]:
        x = run_decoder_layer(x, enc_src, tbias, sbias, lp, n_head)

    return run_final_linear(x, params["lin_w"], params["lin_b"])


if __name__ == "__main__":
    key = jax.random.PRNGKey(0)
    B, T, S = 2, 8, 8
    d_model, ffn_hidden, n_head, n_layers = 32, 64, 4, 2
    dec_voc_size, max_len = 50, 16

    k_param, k_trg, k_enc = jax.random.split(key, 3)
    params = init_decoder_params(k_param, dec_voc_size, max_len, d_model,
                                 ffn_hidden, n_head, n_layers)

    trg = jax.random.randint(k_trg, (B, T), 0, dec_voc_size)
    enc_src = jax.random.normal(k_enc, (B, S, d_model), dtype=jnp.float32)
    trg_mask = jnp.broadcast_to(jnp.tril(jnp.ones((T, T), jnp.float32)), (B, 1, T, T))
    src_mask = jnp.ones((B, 1, 1, S), jnp.float32)

    out = decoder_forward(params, trg, enc_src, trg_mask, src_mask, n_head)
    jax.block_until_ready(out)
    assert out.shape == (B, T, dec_voc_size), out.shape
    assert bool(jnp.all(jnp.isfinite(out)))
    print("KERNEL_OK")
</pallas_src>

<mosaic_0001>
module attributes {stable_mosaic.version = 11 : i64} {
  func.func @decoder_layer_kernel(%arg0: i32, %arg1: i32, %arg2: memref<1x8x32xf32, #tpu.memory_space<vmem>>, %arg3: memref<1x8x32xf32, #tpu.memory_space<vmem>>, %arg4: memref<1x8x32xf32, #tpu.memory_space<vmem>>, %arg5: memref<1x8x8xbf16, #tpu.memory_space<vmem>>, %arg6: memref<1x1x8xf32, #tpu.memory_space<vmem>>, %arg7: memref<4x32x8xbf16, #tpu.memory_space<vmem>>, %arg8: memref<4x1x8xf32, #tpu.memory_space<vmem>>, %arg9: memref<4x32x8xbf16, #tpu.memory_space<vmem>>, %arg10: memref<4x1x8xf32, #tpu.memory_space<vmem>>, %arg11: memref<4x32x8xbf16, #tpu.memory_space<vmem>>, %arg12: memref<4x1x8xf32, #tpu.memory_space<vmem>>, %arg13: memref<4x8x32xbf16, #tpu.memory_space<vmem>>, %arg14: memref<1x32xf32, #tpu.memory_space<vmem>>, %arg15: memref<1x32xf32, #tpu.memory_space<vmem>>, %arg16: memref<1x32xf32, #tpu.memory_space<vmem>>, %arg17: memref<4x32x8xbf16, #tpu.memory_space<vmem>>, %arg18: memref<4x1x8xf32, #tpu.memory_space<vmem>>, %arg19: memref<4x32x8xbf16, #tpu.memory_space<vmem>>, %arg20: memref<4x1x8xf32, #tpu.memory_space<vmem>>, %arg21: memref<4x32x8xbf16, #tpu.memory_space<vmem>>, %arg22: memref<4x1x8xf32, #tpu.memory_space<vmem>>, %arg23: memref<4x8x32xbf16, #tpu.memory_space<vmem>>, %arg24: memref<1x32xf32, #tpu.memory_space<vmem>>, %arg25: memref<1x32xf32, #tpu.memory_space<vmem>>, %arg26: memref<1x32xf32, #tpu.memory_space<vmem>>, %arg27: memref<32x64xbf16, #tpu.memory_space<vmem>>, %arg28: memref<1x64xf32, #tpu.memory_space<vmem>>, %arg29: memref<64x32xbf16, #tpu.memory_space<vmem>>, %arg30: memref<1x32xf32, #tpu.memory_space<vmem>>, %arg31: memref<1x32xf32, #tpu.memory_space<vmem>>, %arg32: memref<1x32xf32, #tpu.memory_space<vmem>>, %arg33: memref<1x8x32xf32, #tpu.memory_space<vmem>>) attributes {dimension_semantics = [#tpu.dimension_semantics<parallel>, #tpu.dimension_semantics<parallel>], iteration_bounds = array<i64: 2, 1>, scalar_prefetch = 0 : i64, scratch_operands = 0 : i64, tpu.core_type = #tpu.core_type<tc>, window_params = [{transform_indices = @transform_0, window_bounds = array<i64: 1, 8, 32>}, {transform_indices = @transform_1, window_bounds = array<i64: 1, 8, 32>}, {transform_indices = @transform_2, window_bounds = array<i64: 1, 8, 32>}, {transform_indices = @transform_3, window_bounds = array<i64: 1, 8, 8>}, {transform_indices = @transform_4, window_bounds = array<i64: 1, 1, 8>}, {pipeline_mode = #tpu.pipeline_mode<synchronous>, transform_indices = @transform_5, window_bounds = array<i64: 4, 32, 8>}, {pipeline_mode = #tpu.pipeline_mode<synchronous>, transform_indices = @transform_6, window_bounds = array<i64: 4, 1, 8>}, {pipeline_mode = #tpu.pipeline_mode<synchronous>, transform_indices = @transform_7, window_bounds = array<i64: 4, 32, 8>}, {pipeline_mode = #tpu.pipeline_mode<synchronous>, transform_indices = @transform_8, window_bounds = array<i64: 4, 1, 8>}, {pipeline_mode = #tpu.pipeline_mode<synchronous>, transform_indices = @transform_9, window_bounds = array<i64: 4, 32, 8>}, {pipeline_mode = #tpu.pipeline_mode<synchronous>, transform_indices = @transform_10, window_bounds = array<i64: 4, 1, 8>}, {pipeline_mode = #tpu.pipeline_mode<synchronous>, transform_indices = @transform_11, window_bounds = array<i64: 4, 8, 32>}, {pipeline_mode = #tpu.pipeline_mode<synchronous>, transform_indices = @transform_12, window_bounds = array<i64: 1, 32>}, {pipeline_mode = #tpu.pipeline_mode<synchronous>, transform_indices = @transform_13, window_bounds = array<i64: 1, 32>}, {pipeline_mode = #tpu.pipeline_mode<synchronous>, transform_indices = @transform_14, window_bounds = array<i64: 1, 32>}, {pipeline_mode = #tpu.pipeline_mode<synchronous>, transform_indices = @transform_15, window_bounds = array<i64: 4, 32, 8>}, {pipeline_mode = #tpu.pipeline_mode<synchronous>, transform_indices = @transform_16, window_bounds = array<i64: 4, 1, 8>}, {pipeline_mode = #tpu.pipeline_mode<synchronous>, transform_indices = @transform_17, window_bounds = array<i64: 4, 32, 8>}, {pipeline_mode = #tpu.pipeline_mode<synchronous>, transform_indices = @transform_18, window_bounds = array<i64: 4, 1, 8>}, {pipeline_mode = #tpu.pipeline_mode<synchronous>, transform_indices = @transform_19, window_bounds = array<i64: 4, 32, 8>}, {pipeline_mode = #tpu.pipeline_mode<synchronous>, transform_indices = @transform_20, window_bounds = array<i64: 4, 1, 8>}, {pipeline_mode = #tpu.pipeline_mode<synchronous>, transform_indices = @transform_21, window_bounds = array<i64: 4, 8, 32>}, {pipeline_mode = #tpu.pipeline_mode<synchronous>, transform_indices = @transform_22, window_bounds = array<i64: 1, 32>}, {pipeline_mode = #tpu.pipeline_mode<synchronous>, transform_indices = @transform_23, window_bounds = array<i64: 1, 32>}, {pipeline_mode = #tpu.pipeline_mode<synchronous>, transform_indices = @transform_24, window_bounds = array<i64: 1, 32>}, {pipeline_mode = #tpu.pipeline_mode<synchronous>, transform_indices = @transform_25, window_bounds = array<i64: 32, 64>}, {pipeline_mode = #tpu.pipeline_mode<synchronous>, transform_indices = @transform_26, window_bounds = array<i64: 1, 64>}, {pipeline_mode = #tpu.pipeline_mode<synchronous>, transform_indices = @transform_27, window_bounds = array<i64: 64, 32>}, {pipeline_mode = #tpu.pipeline_mode<synchronous>, transform_indices = @transform_28, window_bounds = array<i64: 1, 32>}, {pipeline_mode = #tpu.pipeline_mode<synchronous>, transform_indices = @transform_29, window_bounds = array<i64: 1, 32>}, {pipeline_mode = #tpu.pipeline_mode<synchronous>, transform_indices = @transform_30, window_bounds = array<i64: 1, 32>}, {transform_indices = @transform_31, window_bounds = array<i64: 1, 8, 32>}]} {
    %c0 = arith.constant 0 : index
    %c0_0 = arith.constant 0 : index
    %c0_1 = arith.constant 0 : index
    %0 = vector.load %arg2[%c0, %c0_0, %c0_1] : memref<1x8x32xf32, #tpu.memory_space<vmem>>, vector<1x8x32xf32>
    %1 = vector.shape_cast %0 : vector<1x8x32xf32> to vector<8x32xf32>
    %c0_2 = arith.constant 0 : index
    %c0_3 = arith.constant 0 : index
    %c0_4 = arith.constant 0 : index
    %2 = vector.load %arg3[%c0_2, %c0_3, %c0_4] : memref<1x8x32xf32, #tpu.memory_space<vmem>>, vector<1x8x32xf32>
    %3 = vector.shape_cast %2 : vector<1x8x32xf32> to vector<8x32xf32>
    %c0_5 = arith.constant 0 : index
    %c0_6 = arith.constant 0 : index
    %c0_7 = arith.constant 0 : index
    %4 = vector.load %arg4[%c0_5, %c0_6, %c0_7] : memref<1x8x32xf32, #tpu.memory_space<vmem>>, vector<1x8x32xf32>
    %5 = vector.shape_cast %4 : vector<1x8x32xf32> to vector<8x32xf32>
    %c0_8 = arith.constant 0 : index
    %c0_9 = arith.constant 0 : index
    %c0_10 = arith.constant 0 : index
    %6 = vector.load %arg5[%c0_8, %c0_9, %c0_10] : memref<1x8x8xbf16, #tpu.memory_space<vmem>>, vector<1x8x8xbf16>
    %7 = vector.shape_cast %6 : vector<1x8x8xbf16> to vector<8x8xbf16>
    %c0_11 = arith.constant 0 : index
    %c0_12 = arith.constant 0 : index
    %c0_13 = arith.constant 0 : index
    %8 = vector.load %arg6[%c0_11, %c0_12, %c0_13] : memref<1x1x8xf32, #tpu.memory_space<vmem>>, vector<1x1x8xf32>
    %9 = vector.shape_cast %8 : vector<1x1x8xf32> to vector<1x8xf32>
    %c0_14 = arith.constant 0 : index
    %c0_15 = arith.constant 0 : index
    %c0_16 = arith.constant 0 : index
    %10 = vector.load %arg7[%c0_14, %c0_15, %c0_16] : memref<4x32x8xbf16, #tpu.memory_space<vmem>>, vector<4x32x8xbf16>
    %c0_17 = arith.constant 0 : index
    %c0_18 = arith.constant 0 : index
    %c0_19 = arith.constant 0 : index
    %11 = vector.load %arg8[%c0_17, %c0_18, %c0_19] : memref<4x1x8xf32, #tpu.memory_space<vmem>>, vector<4x1x8xf32>
    %c0_20 = arith.constant 0 : index
    %c0_21 = arith.constant 0 : index
    %c0_22 = arith.constant 0 : index
    %12 = vector.load %arg9[%c0_20, %c0_21, %c0_22] : memref<4x32x8xbf16, #tpu.memory_space<vmem>>, vector<4x32x8xbf16>
    %c0_23 = arith.constant 0 : index
    %c0_24 = arith.constant 0 : index
    %c0_25 = arith.constant 0 : index
    %13 = vector.load %arg10[%c0_23, %c0_24, %c0_25] : memref<4x1x8xf32, #tpu.memory_space<vmem>>, vector<4x1x8xf32>
    %c0_26 = arith.constant 0 : index
    %c0_27 = arith.constant 0 : index
    %c0_28 = arith.constant 0 : index
    %14 = vector.load %arg11[%c0_26, %c0_27, %c0_28] : memref<4x32x8xbf16, #tpu.memory_space<vmem>>, vector<4x32x8xbf16>
    %c0_29 = arith.constant 0 : index
    %c0_30 = arith.constant 0 : index
    %c0_31 = arith.constant 0 : index
    %15 = vector.load %arg12[%c0_29, %c0_30, %c0_31] : memref<4x1x8xf32, #tpu.memory_space<vmem>>, vector<4x1x8xf32>
    %c0_32 = arith.constant 0 : index
    %c0_33 = arith.constant 0 : index
    %c0_34 = arith.constant 0 : index
    %16 = vector.load %arg13[%c0_32, %c0_33, %c0_34] : memref<4x8x32xbf16, #tpu.memory_space<vmem>>, vector<4x8x32xbf16>
    %c0_35 = arith.constant 0 : index
    %c0_36 = arith.constant 0 : index
    %17 = vector.load %arg14[%c0_35, %c0_36] : memref<1x32xf32, #tpu.memory_space<vmem>>, vector<1x32xf32>
    %18 = arith.truncf %1 : vector<8x32xf32> to vector<8x32xbf16>
    %19 = vector.shape_cast %18 : vector<8x32xbf16> to vector<1x8x32xbf16>
    %20 = vector.shape_cast %19 : vector<1x8x32xbf16> to vector<1x8x32xbf16>
    %21 = vector.broadcast %20 : vector<1x8x32xbf16> to vector<4x8x32xbf16>
    %22 = arith.truncf %3 : vector<8x32xf32> to vector<8x32xbf16>
    %23 = vector.shape_cast %22 : vector<8x32xbf16> to vector<1x8x32xbf16>
    %24 = vector.shape_cast %23 : vector<1x8x32xbf16> to vector<1x8x32xbf16>
    %25 = vector.broadcast %24 : vector<1x8x32xbf16> to vector<4x8x32xbf16>
    %cst = arith.constant dense<0.000000e+00> : vector<4x8x8xf32>
    %26 = tpu.matmul %21, %10, %cst {dimension_numbers = #tpu.dot_dimension_numbers<[2], [1], [1], [2], [0, 0, 0, 1, 1, 2], [0], [0]>} : vector<4x8x32xbf16>, vector<4x32x8xbf16>, vector<4x8x8xf32> -> vector<4x8x8xf32>
    %27 = vector.broadcast %11 : vector<4x1x8xf32> to vector<4x8x8xf32>
    %28 = arith.addf %26, %27 : vector<4x8x8xf32>
    %cst_37 = arith.constant dense<0.000000e+00> : vector<4x8x8xf32>
    %29 = tpu.matmul %25, %12, %cst_37 {dimension_numbers = #tpu.dot_dimension_numbers<[2], [1], [1], [2], [0, 0, 0, 1, 1, 2], [0], [0]>} : vector<4x8x32xbf16>, vector<4x32x8xbf16>, vector<4x8x8xf32> -> vector<4x8x8xf32>
    %30 = vector.broadcast %13 : vector<4x1x8xf32> to vector<4x8x8xf32>
    %31 = arith.addf %29, %30 : vector<4x8x8xf32>
    %cst_38 = arith.constant dense<0.000000e+00> : vector<4x8x8xf32>
    %32 = tpu.matmul %25, %14, %cst_38 {dimension_numbers = #tpu.dot_dimension_numbers<[2], [1], [1], [2], [0, 0, 0, 1, 1, 2], [0], [0]>} : vector<4x8x32xbf16>, vector<4x32x8xbf16>, vector<4x8x8xf32> -> vector<4x8x8xf32>
    %33 = vector.broadcast %15 : vector<4x1x8xf32> to vector<4x8x8xf32>
    %34 = arith.addf %32, %33 : vector<4x8x8xf32>
    %cst_39 = arith.constant 0.353553385 : f32
    %35 = vector.broadcast %cst_39 : f32 to vector<4x8x8xf32>
    %36 = arith.mulf %28, %35 : vector<4x8x8xf32>
    %37 = arith.truncf %36 : vector<4x8x8xf32> to vector<4x8x8xbf16>
    %38 = arith.truncf %31 : vector<4x8x8xf32> to vector<4x8x8xbf16>
    %cst_40 = arith.constant dense<0.000000e+00> : vector<4x8x8xf32>
    %39 = tpu.matmul %37, %38, %cst_40 {dimension_numbers = #tpu.dot_dimension_numbers<[2], [2], [1], [1], [0, 0, 0, 1, 1, 1], [0], [0]>} : vector<4x8x8xbf16>, vector<4x8x8xbf16>, vector<4x8x8xf32> -> vector<4x8x8xf32>
    %40 = arith.extf %7 : vector<8x8xbf16> to vector<8x8xf32>
    %41 = vector.shape_cast %40 : vector<8x8xf32> to vector<1x8x8xf32>
    %42 = vector.broadcast %41 : vector<1x8x8xf32> to vector<4x8x8xf32>
    %43 = arith.addf %39, %42 : vector<4x8x8xf32>
    %cst_41 = arith.constant dense<0xFF800000> : vector<4x8xf32>
    %44 = vector.multi_reduction <maximumf>, %43, %cst_41 [2] : vector<4x8x8xf32> to vector<4x8xf32>
    %45 = vector.shape_cast %44 : vector<4x8xf32> to vector<4x8x1xf32>
    %46 = vector.broadcast %45 : vector<4x8x1xf32> to vector<4x8x8xf32>
    %47 = arith.subf %43, %46 : vector<4x8x8xf32>
    %48 = math.exp %47 : vector<4x8x8xf32>
    %cst_42 = arith.constant dense<0.000000e+00> : vector<4x8xf32>
    %49 = vector.multi_reduction <add>, %48, %cst_42 [2] : vector<4x8x8xf32> to vector<4x8xf32>
    %50 = vector.shape_cast %49 : vector<4x8xf32> to vector<4x8x1xf32>
    %51 = tpu.reciprocal %50 {approx = true} : vector<4x8x1xf32> -> vector<4x8x1xf32>
    %52 = vector.broadcast %51 : vector<4x8x1xf32> to vector<4x8x8xf32>
    %53 = arith.mulf %48, %52 : vector<4x8x8xf32>
    %54 = arith.truncf %53 : vector<4x8x8xf32> to vector<4x8x8xbf16>
    %55 = arith.truncf %34 : vector<4x8x8xf32> to vector<4x8x8xbf16>
    %cst_43 = arith.constant dense<0.000000e+00> : vector<4x8x8xf32>
    %56 = tpu.matmul %54, %55, %cst_43 {dimension_numbers = #tpu.dot_dimension_numbers<[2], [1], [1], [2], [0, 0, 0, 1, 1, 2], [0], [0]>} : vector<4x8x8xbf16>, vector<4x8x8xbf16>, vector<4x8x8xf32> -> vector<4x8x8xf32>
    %57 = arith.truncf %56 : vector<4x8x8xf32> to vector<4x8x8xbf16>
    %cst_44 = arith.constant dense<0.000000e+00> : vector<4x8x32xf32>
    %58 = tpu.matmul %57, %16, %cst_44 {dimension_numbers = #tpu.dot_dimension_numbers<[2], [1], [1], [2], [0, 0, 0, 1, 1, 2], [0], [0]>} : vector<4x8x8xbf16>, vector<4x8x32xbf16>, vector<4x8x32xf32> -> vector<4x8x32xf32>
    %cst_45 = arith.constant dense<0.000000e+00> : vector<8x32xf32>
    %59 = vector.multi_reduction <add>, %58, %cst_45 [0] : vector<4x8x32xf32> to vector<8x32xf32>
    %60 = vector.broadcast %17 : vector<1x32xf32> to vector<8x32xf32>
    %61 = arith.addf %59, %60 : vector<8x32xf32>
    %62 = arith.addf %61, %1 : vector<8x32xf32>
    %c0_46 = arith.constant 0 : index
    %c0_47 = arith.constant 0 : index
    %63 = vector.load %arg15[%c0_46, %c0_47] : memref<1x32xf32, #tpu.memory_space<vmem>>, vector<1x32xf32>
    %c0_48 = arith.constant 0 : index
    %c0_49 = arith.constant 0 : index
    %64 = vector.load %arg16[%c0_48, %c0_49] : memref<1x32xf32, #tpu.memory_space<vmem>>, vector<1x32xf32>
    %cst_50 = arith.constant dense<0.000000e+00> : vector<8xf32>
    %65 = vector.multi_reduction <add>, %62, %cst_50 [1] : vector<8x32xf32> to vector<8xf32>
    %66 = vector.shape_cast %65 : vector<8xf32> to vector<8x1xf32>
    %cst_51 = arith.constant 3.200000e+01 : f32
    %67 = vector.broadcast %cst_51 : f32 to vector<8x1xf32>
    %68 = arith.divf %66, %67 : vector<8x1xf32>
    %69 = vector.broadcast %68 : vector<8x1xf32> to vector<8x32xf32>
    %70 = arith.subf %62, %69 : vector<8x32xf32>
    %71 = arith.mulf %70, %70 : vector<8x32xf32>
    %cst_52 = arith.constant dense<0.000000e+00> : vector<8xf32>
    %72 = vector.multi_reduction <add>, %71, %cst_52 [1] : vector<8x32xf32> to vector<8xf32>
    %73 = vector.shape_cast %72 : vector<8xf32> to vector<8x1xf32>
    %cst_53 = arith.constant 3.200000e+01 : f32
    %74 = vector.broadcast %cst_53 : f32 to vector<8x1xf32>
    %75 = arith.divf %73, %74 : vector<8x1xf32>
    %cst_54 = arith.constant 9.99999996E-13 : f32
    %76 = vector.broadcast %cst_54 : f32 to vector<8x1xf32>
    %77 = arith.addf %75, %76 : vector<8x1xf32>
    %78 = math.rsqrt %77 : vector<8x1xf32>
    %79 = vector.broadcast %78 : vector<8x1xf32> to vector<8x32xf32>
    %80 = arith.mulf %70, %79 : vector<8x32xf32>
    %81 = vector.broadcast %63 : vector<1x32xf32> to vector<8x32xf32>
    %82 = arith.mulf %80, %81 : vector<8x32xf32>
    %83 = vector.broadcast %64 : vector<1x32xf32> to vector<8x32xf32>
    %84 = arith.addf %82, %83 : vector<8x32xf32>
    %c0_55 = arith.constant 0 : index
    %c0_56 = arith.constant 0 : index
    %c0_57 = arith.constant 0 : index
    %85 = vector.load %arg17[%c0_55, %c0_56, %c0_57] : memref<4x32x8xbf16, #tpu.memory_space<vmem>>, vector<4x32x8xbf16>
    %c0_58 = arith.constant 0 : index
    %c0_59 = arith.constant 0 : index
    %c0_60 = arith.constant 0 : index
    %86 = vector.load %arg18[%c0_58, %c0_59, %c0_60] : memref<4x1x8xf32, #tpu.memory_space<vmem>>, vector<4x1x8xf32>
    %c0_61 = arith.constant 0 : index
    %c0_62 = arith.constant 0 : index
    %c0_63 = arith.constant 0 : index
    %87 = vector.load %arg19[%c0_61, %c0_62, %c0_63] : memref<4x32x8xbf16, #tpu.memory_space<vmem>>, vector<4x32x8xbf16>
    %c0_64 = arith.constant 0 : index
    %c0_65 = arith.constant 0 : index
    %c0_66 = arith.constant 0 : index
    %88 = vector.load %arg20[%c0_64, %c0_65, %c0_66] : memref<4x1x8xf32, #tpu.memory_space<vmem>>, vector<4x1x8xf32>
    %c0_67 = arith.constant 0 : index
    %c0_68 = arith.constant 0 : index
    %c0_69 = arith.constant 0 : index
    %89 = vector.load %arg21[%c0_67, %c0_68, %c0_69] : memref<4x32x8xbf16, #tpu.memory_space<vmem>>, vector<4x32x8xbf16>
    %c0_70 = arith.constant 0 : index
    %c0_71 = arith.constant 0 : index
    %c0_72 = arith.constant 0 : index
    %90 = vector.load %arg22[%c0_70, %c0_71, %c0_72] : memref<4x1x8xf32, #tpu.memory_space<vmem>>, vector<4x1x8xf32>
    %c0_73 = arith.constant 0 : index
    %c0_74 = arith.constant 0 : index
    %c0_75 = arith.constant 0 : index
    %91 = vector.load %arg23[%c0_73, %c0_74, %c0_75] : memref<4x8x32xbf16, #tpu.memory_space<vmem>>, vector<4x8x32xbf16>
    %c0_76 = arith.constant 0 : index
    %c0_77 = arith.constant 0 : index
    %92 = vector.load %arg24[%c0_76, %c0_77] : memref<1x32xf32, #tpu.memory_space<vmem>>, vector<1x32xf32>
    %93 = arith.truncf %84 : vector<8x32xf32> to vector<8x32xbf16>
    %94 = vector.shape_cast %93 : vector<8x32xbf16> to vector<1x8x32xbf16>
    %95 = vector.shape_cast %94 : vector<1x8x32xbf16> to vector<1x8x32xbf16>
    %96 = vector.broadcast %95 : vector<1x8x32xbf16> to vector<4x8x32xbf16>
    %97 = arith.truncf %5 : vector<8x32xf32> to vector<8x32xbf16>
    %98 = vector.shape_cast %97 : vector<8x32xbf16> to vector<1x8x32xbf16>
    %99 = vector.shape_cast %98 : vector<1x8x32xbf16> to vector<1x8x32xbf16>
    %100 = vector.broadcast %99 : vector<1x8x32xbf16> to vector<4x8x32xbf16>
    %cst_78 = arith.constant dense<0.000000e+00> : vector<4x8x8xf32>
    %101 = tpu.matmul %96, %85, %cst_78 {dimension_numbers = #tpu.dot_dimension_numbers<[2], [1], [1], [2], [0, 0, 0, 1, 1, 2], [0], [0]>} : vector<4x8x32xbf16>, vector<4x32x8xbf16>, vector<4x8x8xf32> -> vector<4x8x8xf32>
    %102 = vector.broadcast %86 : vector<4x1x8xf32> to vector<4x8x8xf32>
    %103 = arith.addf %101, %102 : vector<4x8x8xf32>
    %cst_79 = arith.constant dense<0.000000e+00> : vector<4x8x8xf32>
    %104 = tpu.matmul %100, %87, %cst_79 {dimension_numbers = #tpu.dot_dimension_numbers<[2], [1], [1], [2], [0, 0, 0, 1, 1, 2], [0], [0]>} : vector<4x8x32xbf16>, vector<4x32x8xbf16>, vector<4x8x8xf32> -> vector<4x8x8xf32>
    %105 = vector.broadcast %88 : vector<4x1x8xf32> to vector<4x8x8xf32>
    %106 = arith.addf %104, %105 : vector<4x8x8xf32>
    %cst_80 = arith.constant dense<0.000000e+00> : vector<4x8x8xf32>
    %107 = tpu.matmul %100, %89, %cst_80 {dimension_numbers = #tpu.dot_dimension_numbers<[2], [1], [1], [2], [0, 0, 0, 1, 1, 2], [0], [0]>} : vector<4x8x32xbf16>, vector<4x32x8xbf16>, vector<4x8x8xf32> -> vector<4x8x8xf32>
    %108 = vector.broadcast %90 : vector<4x1x8xf32> to vector<4x8x8xf32>
    %109 = arith.addf %107, %108 : vector<4x8x8xf32>
    %cst_81 = arith.constant 0.353553385 : f32
    %110 = vector.broadcast %cst_81 : f32 to vector<4x8x8xf32>
    %111 = arith.mulf %103, %110 : vector<4x8x8xf32>
    %112 = arith.truncf %111 : vector<4x8x8xf32> to vector<4x8x8xbf16>
    %113 = arith.truncf %106 : vector<4x8x8xf32> to vector<4x8x8xbf16>
    %cst_82 = arith.constant dense<0.000000e+00> : vector<4x8x8xf32>
    %114 = tpu.matmul %112, %113, %cst_82 {dimension_numbers = #tpu.dot_dimension_numbers<[2], [2], [1], [1], [0, 0, 0, 1, 1, 1], [0], [0]>} : vector<4x8x8xbf16>, vector<4x8x8xbf16>, vector<4x8x8xf32> -> vector<4x8x8xf32>
    %115 = vector.shape_cast %9 : vector<1x8xf32> to vector<1x1x8xf32>
    %116 = vector.broadcast %115 : vector<1x1x8xf32> to vector<4x8x8xf32>
    %117 = arith.addf %114, %116 : vector<4x8x8xf32>
    %cst_83 = arith.constant dense<0xFF800000> : vector<4x8xf32>
    %118 = vector.multi_reduction <maximumf>, %117, %cst_83 [2] : vector<4x8x8xf32> to vector<4x8xf32>
    %119 = vector.shape_cast %118 : vector<4x8xf32> to vector<4x8x1xf32>
    %120 = vector.broadcast %119 : vector<4x8x1xf32> to vector<4x8x8xf32>
    %121 = arith.subf %117, %120 : vector<4x8x8xf32>
    %122 = math.exp %121 : vector<4x8x8xf32>
    %cst_84 = arith.constant dense<0.000000e+00> : vector<4x8xf32>
    %123 = vector.multi_reduction <add>, %122, %cst_84 [2] : vector<4x8x8xf32> to vector<4x8xf32>
    %124 = vector.shape_cast %123 : vector<4x8xf32> to vector<4x8x1xf32>
    %125 = tpu.reciprocal %124 {approx = true} : vector<4x8x1xf32> -> vector<4x8x1xf32>
    %126 = vector.broadcast %125 : vector<4x8x1xf32> to vector<4x8x8xf32>
    %127 = arith.mulf %122, %126 : vector<4x8x8xf32>
    %128 = arith.truncf %127 : vector<4x8x8xf32> to vector<4x8x8xbf16>
    %129 = arith.truncf %109 : vector<4x8x8xf32> to vector<4x8x8xbf16>
    %cst_85 = arith.constant dense<0.000000e+00> : vector<4x8x8xf32>
    %130 = tpu.matmul %128, %129, %cst_85 {dimension_numbers = #tpu.dot_dimension_numbers<[2], [1], [1], [2], [0, 0, 0, 1, 1, 2], [0], [0]>} : vector<4x8x8xbf16>, vector<4x8x8xbf16>, vector<4x8x8xf32> -> vector<4x8x8xf32>
    %131 = arith.truncf %130 : vector<4x8x8xf32> to vector<4x8x8xbf16>
    %cst_86 = arith.constant dense<0.000000e+00> : vector<4x8x32xf32>
    %132 = tpu.matmul %131, %91, %cst_86 {dimension_numbers = #tpu.dot_dimension_numbers<[2], [1], [1], [2], [0, 0, 0, 1, 1, 2], [0], [0]>} : vector<4x8x8xbf16>, vector<4x8x32xbf16>, vector<4x8x32xf32> -> vector<4x8x32xf32>
    %cst_87 = arith.constant dense<0.000000e+00> : vector<8x32xf32>
    %133 = vector.multi_reduction <add>, %132, %cst_87 [0] : vector<4x8x32xf32> to vector<8x32xf32>
    %134 = vector.broadcast %92 : vector<1x32xf32> to vector<8x32xf32>
    %135 = arith.addf %133, %134 : vector<8x32xf32>
    %136 = arith.addf %135, %84 : vector<8x32xf32>
    %c0_88 = arith.constant 0 : index
    %c0_89 = arith.constant 0 : index
    %137 = vector.load %arg25[%c0_88, %c0_89] : memref<1x32xf32, #tpu.memory_space<vmem>>, vector<1x32xf32>
    %c0_90 = arith.constant 0 : index
    %c0_91 = arith.constant 0 : index
    %138 = vector.load %arg26[%c0_90, %c0_91] : memref<1x32xf32, #tpu.memory_space<vmem>>, vector<1x32xf32>
    %cst_92 = arith.constant dense<0.000000e+00> : vector<8xf32>
    %139 = vector.multi_reduction <add>, %136, %cst_92 [1] : vector<8x32xf32> to vector<8xf32>
    %140 = vector.shape_cast %139 : vector<8xf32> to vector<8x1xf32>
    %cst_93 = arith.constant 3.200000e+01 : f32
    %141 = vector.broadcast %cst_93 : f32 to vector<8x1xf32>
    %142 = arith.divf %140, %141 : vector<8x1xf32>
    %143 = vector.broadcast %142 : vector<8x1xf32> to vector<8x32xf32>
    %144 = arith.subf %136, %143 : vector<8x32xf32>
    %145 = arith.mulf %144, %144 : vector<8x32xf32>
    %cst_94 = arith.constant dense<0.000000e+00> : vector<8xf32>
    %146 = vector.multi_reduction <add>, %145, %cst_94 [1] : vector<8x32xf32> to vector<8xf32>
    %147 = vector.shape_cast %146 : vector<8xf32> to vector<8x1xf32>
    %cst_95 = arith.constant 3.200000e+01 : f32
    %148 = vector.broadcast %cst_95 : f32 to vector<8x1xf32>
    %149 = arith.divf %147, %148 : vector<8x1xf32>
    %cst_96 = arith.constant 9.99999996E-13 : f32
    %150 = vector.broadcast %cst_96 : f32 to vector<8x1xf32>
    %151 = arith.addf %149, %150 : vector<8x1xf32>
    %152 = math.rsqrt %151 : vector<8x1xf32>
    %153 = vector.broadcast %152 : vector<8x1xf32> to vector<8x32xf32>
    %154 = arith.mulf %144, %153 : vector<8x32xf32>
    %155 = vector.broadcast %137 : vector<1x32xf32> to vector<8x32xf32>
    %156 = arith.mulf %154, %155 : vector<8x32xf32>
    %157 = vector.broadcast %138 : vector<1x32xf32> to vector<8x32xf32>
    %158 = arith.addf %156, %157 : vector<8x32xf32>
    %159 = arith.truncf %158 : vector<8x32xf32> to vector<8x32xbf16>
    %c0_97 = arith.constant 0 : index
    %c0_98 = arith.constant 0 : index
    %160 = vector.load %arg27[%c0_97, %c0_98] : memref<32x64xbf16, #tpu.memory_space<vmem>>, vector<32x64xbf16>
    %cst_99 = arith.constant dense<0.000000e+00> : vector<8x64xf32>
    %161 = tpu.matmul %159, %160, %cst_99 {dimension_numbers = #tpu.dot_dimension_numbers<[1], [0], [0], [1], [0, 0, 1, 1], [], []>} : vector<8x32xbf16>, vector<32x64xbf16>, vector<8x64xf32> -> vector<8x64xf32>
    %c0_100 = arith.constant 0 : index
    %c0_101 = arith.constant 0 : index
    %162 = vector.load %arg28[%c0_100, %c0_101] : memref<1x64xf32, #tpu.memory_space<vmem>>, vector<1x64xf32>
    %163 = vector.broadcast %162 : vector<1x64xf32> to vector<8x64xf32>
    %164 = arith.addf %161, %163 : vector<8x64xf32>
    %cst_102 = arith.constant 0.000000e+00 : f32
    %165 = vector.broadcast %cst_102 : f32 to vector<8x64xf32>
    %166 = arith.maximumf %164, %165 : vector<8x64xf32>
    %167 = arith.truncf %166 : vector<8x64xf32> to vector<8x64xbf16>
    %c0_103 = arith.constant 0 : index
    %c0_104 = arith.constant 0 : index
    %168 = vector.load %arg29[%c0_103, %c0_104] : memref<64x32xbf16, #tpu.memory_space<vmem>>, vector<64x32xbf16>
    %cst_105 = arith.constant dense<0.000000e+00> : vector<8x32xf32>
    %169 = tpu.matmul %167, %168, %cst_105 {dimension_numbers = #tpu.dot_dimension_numbers<[1], [0], [0], [1], [0, 0, 1, 1], [], []>} : vector<8x64xbf16>, vector<64x32xbf16>, vector<8x32xf32> -> vector<8x32xf32>
    %c0_106 = arith.constant 0 : index
    %c0_107 = arith.constant 0 : index
    %170 = vector.load %arg30[%c0_106, %c0_107] : memref<1x32xf32, #tpu.memory_space<vmem>>, vector<1x32xf32>
    %171 = vector.broadcast %170 : vector<1x32xf32> to vector<8x32xf32>
    %172 = arith.addf %169, %171 : vector<8x32xf32>
    %173 = arith.addf %172, %158 : vector<8x32xf32>
    %c0_108 = arith.constant 0 : index
    %c0_109 = arith.constant 0 : index
    %174 = vector.load %arg31[%c0_108, %c0_109] : memref<1x32xf32, #tpu.memory_space<vmem>>, vector<1x32xf32>
    %c0_110 = arith.constant 0 : index
    %c0_111 = arith.constant 0 : index
    %175 = vector.load %arg32[%c0_110, %c0_111] : memref<1x32xf32, #tpu.memory_space<vmem>>, vector<1x32xf32>
    %cst_112 = arith.constant dense<0.000000e+00> : vector<8xf32>
    %176 = vector.multi_reduction <add>, %173, %cst_112 [1] : vector<8x32xf32> to vector<8xf32>
    %177 = vector.shape_cast %176 : vector<8xf32> to vector<8x1xf32>
    %cst_113 = arith.constant 3.200000e+01 : f32
    %178 = vector.broadcast %cst_113 : f32 to vector<8x1xf32>
    %179 = arith.divf %177, %178 : vector<8x1xf32>
    %180 = vector.broadcast %179 : vector<8x1xf32> to vector<8x32xf32>
    %181 = arith.subf %173, %180 : vector<8x32xf32>
    %182 = arith.mulf %181, %181 : vector<8x32xf32>
    %cst_114 = arith.constant dense<0.000000e+00> : vector<8xf32>
    %183 = vector.multi_reduction <add>, %182, %cst_114 [1] : vector<8x32xf32> to vector<8xf32>
    %184 = vector.shape_cast %183 : vector<8xf32> to vector<8x1xf32>
    %cst_115 = arith.constant 3.200000e+01 : f32
    %185 = vector.broadcast %cst_115 : f32 to vector<8x1xf32>
    %186 = arith.divf %184, %185 : vector<8x1xf32>
    %cst_116 = arith.constant 9.99999996E-13 : f32
    %187 = vector.broadcast %cst_116 : f32 to vector<8x1xf32>
    %188 = arith.addf %186, %187 : vector<8x1xf32>
    %189 = math.rsqrt %188 : vector<8x1xf32>
    %190 = vector.broadcast %189 : vector<8x1xf32> to vector<8x32xf32>
    %191 = arith.mulf %181, %190 : vector<8x32xf32>
    %192 = vector.broadcast %174 : vector<1x32xf32> to vector<8x32xf32>
    %193 = arith.mulf %191, %192 : vector<8x32xf32>
    %194 = vector.broadcast %175 : vector<1x32xf32> to vector<8x32xf32>
    %195 = arith.addf %193, %194 : vector<8x32xf32>
    %c0_117 = arith.constant 0 : index
    %c0_118 = arith.constant 0 : index
    %c0_119 = arith.constant 0 : index
    %196 = vector.load %arg33[%c0_117, %c0_118, %c0_119] : memref<1x8x32xf32, #tpu.memory_space<vmem>>, vector<1x8x32xf32>
    %197 = vector.shape_cast %196 : vector<1x8x32xf32> to vector<8x32xf32>
    %198 = vector.shape_cast %195 : vector<8x32xf32> to vector<1x8x32xf32>
    tpu.vector_store %arg33[%c0_117, %c0_118, %c0_119], %198 {strides = array<i32>} : memref<1x8x32xf32, #tpu.memory_space<vmem>>, vector<1x8x32xf32>,
    return
  }
  func.func @transform_0(%arg0: i32, %arg1: i32) -> (i32, i32, i32) {
    %c0_i32 = arith.constant 0 : i32
    %c0_i32_0 = arith.constant 0 : i32
    return %arg0, %arg1, %c0_i32 : i32, i32, i32
  }
  func.func @transform_1(%arg0: i32, %arg1: i32) -> (i32, i32, i32) {
    %c0_i32 = arith.constant 0 : i32
    %c0_i32_0 = arith.constant 0 : i32
    %c0_i32_1 = arith.constant 0 : i32
    return %arg0, %c0_i32, %c0_i32_0 : i32, i32, i32
  }
  func.func @transform_2(%arg0: i32, %arg1: i32) -> (i32, i32, i32) {
    %c0_i32 = arith.constant 0 : i32
    %c0_i32_0 = arith.constant 0 : i32
    %c0_i32_1 = arith.constant 0 : i32
    return %arg0, %c0_i32, %c0_i32_0 : i32, i32, i32
  }
  func.func @transform_3(%arg0: i32, %arg1: i32) -> (i32, i32, i32) {
    %c0_i32 = arith.constant 0 : i32
    %c0_i32_0 = arith.constant 0 : i32
    return %arg0, %arg1, %c0_i32 : i32, i32, i32
  }
  func.func @transform_4(%arg0: i32, %arg1: i32) -> (i32, i32, i32) {
    %c0_i32 = arith.constant 0 : i32
    %c0_i32_0 = arith.constant 0 : i32
    %c0_i32_1 = arith.constant 0 : i32
    return %arg0, %c0_i32, %c0_i32_0 : i32, i32, i32
  }
  func.func @transform_5(%arg0: i32, %arg1: i32) -> (i32, i32, i32) {
    %c0_i32 = arith.constant 0 : i32
    %c0_i32_0 = arith.constant 0 : i32
    %c0_i32_1 = arith.constant 0 : i32
    %c0_i32_2 = arith.constant 0 : i32
    return %c0_i32, %c0_i32_0, %c0_i32_1 : i32, i32, i32
  }
  func.func @transform_6(%arg0: i32, %arg1: i32) -> (i32, i32, i32) {
    %c0_i32 = arith.constant 0 : i32
    %c0_i32_0 = arith.constant 0 : i32
    %c0_i32_1 = arith.constant 0 : i32
    %c0_i32_2 = arith.constant 0 : i32
    return %c0_i32, %c0_i32_0, %c0_i32_1 : i32, i32, i32
  }
  func.func @transform_7(%arg0: i32, %arg1: i32) -> (i32, i32, i32) {
    %c0_i32 = arith.constant 0 : i32
    %c0_i32_0 = arith.constant 0 : i32
    %c0_i32_1 = arith.constant 0 : i32
    %c0_i32_2 = arith.constant 0 : i32
    return %c0_i32, %c0_i32_0, %c0_i32_1 : i32, i32, i32
  }
  func.func @transform_8(%arg0: i32, %arg1: i32) -> (i32, i32, i32) {
    %c0_i32 = arith.constant 0 : i32
    %c0_i32_0 = arith.constant 0 : i32
    %c0_i32_1 = arith.constant 0 : i32
    %c0_i32_2 = arith.constant 0 : i32
    return %c0_i32, %c0_i32_0, %c0_i32_1 : i32, i32, i32
  }
  func.func @transform_9(%arg0: i32, %arg1: i32) -> (i32, i32, i32) {
    %c0_i32 = arith.constant 0 : i32
    %c0_i32_0 = arith.constant 0 : i32
    %c0_i32_1 = arith.constant 0 : i32
    %c0_i32_2 = arith.constant 0 : i32
    return %c0_i32, %c0_i32_0, %c0_i32_1 : i32, i32, i32
  }
  func.func @transform_10(%arg0: i32, %arg1: i32) -> (i32, i32, i32) {
    %c0_i32 = arith.constant 0 : i32
    %c0_i32_0 = arith.constant 0 : i32
    %c0_i32_1 = arith.constant 0 : i32
    %c0_i32_2 = arith.constant 0 : i32
    return %c0_i32, %c0_i32_0, %c0_i32_1 : i32, i32, i32
  }
  func.func @transform_11(%arg0: i32, %arg1: i32) -> (i32, i32, i32) {
    %c0_i32 = arith.constant 0 : i32
    %c0_i32_0 = arith.constant 0 : i32
    %c0_i32_1 = arith.constant 0 : i32
    %c0_i32_2 = arith.constant 0 : i32
    return %c0_i32, %c0_i32_0, %c0_i32_1 : i32, i32, i32
  }
  func.func @transform_12(%arg0: i32, %arg1: i32) -> (i32, i32) {
    %c0_i32 = arith.constant 0 : i32
    %c0_i32_0 = arith.constant 0 : i32
    %c0_i32_1 = arith.constant 0 : i32
    return %c0_i32, %c0_i32_0 : i32, i32
  }
  func.func @transform_13(%arg0: i32, %arg1: i32) -> (i32, i32) {
    %c0_i32 = arith.constant 0 : i32
    %c0_i32_0 = arith.constant 0 : i32
    %c0_i32_1 = arith.constant 0 : i32
    return %c0_i32, %c0_i32_0 : i32, i32
  }
  func.func @transform_14(%arg0: i32, %arg1: i32) -> (i32, i32) {
    %c0_i32 = arith.constant 0 : i32
    %c0_i32_0 = arith.constant 0 : i32
    %c0_i32_1 = arith.constant 0 : i32
    return %c0_i32, %c0_i32_0 : i32, i32
  }
  func.func @transform_15(%arg0: i32, %arg1: i32) -> (i32, i32, i32) {
    %c0_i32 = arith.constant 0 : i32
    %c0_i32_0 = arith.constant 0 : i32
    %c0_i32_1 = arith.constant 0 : i32
    %c0_i32_2 = arith.constant 0 : i32
    return %c0_i32, %c0_i32_0, %c0_i32_1 : i32, i32, i32
  }
  func.func @transform_16(%arg0: i32, %arg1: i32) -> (i32, i32, i32) {
    %c0_i32 = arith.constant 0 : i32
    %c0_i32_0 = arith.constant 0 : i32
    %c0_i32_1 = arith.constant 0 : i32
    %c0_i32_2 = arith.constant 0 : i32
    return %c0_i32, %c0_i32_0, %c0_i32_1 : i32, i32, i32
  }
  func.func @transform_17(%arg0: i32, %arg1: i32) -> (i32, i32, i32) {
    %c0_i32 = arith.constant 0 : i32
    %c0_i32_0 = arith.constant 0 : i32
    %c0_i32_1 = arith.constant 0 : i32
    %c0_i32_2 = arith.constant 0 : i32
    return %c0_i32, %c0_i32_0, %c0_i32_1 : i32, i32, i32
  }
  func.func @transform_18(%arg0: i32, %arg1: i32) -> (i32, i32, i32) {
    %c0_i32 = arith.constant 0 : i32
    %c0_i32_0 = arith.constant 0 : i32
    %c0_i32_1 = arith.constant 0 : i32
    %c0_i32_2 = arith.constant 0 : i32
    return %c0_i32, %c0_i32_0, %c0_i32_1 : i32, i32, i32
  }
  func.func @transform_19(%arg0: i32, %arg1: i32) -> (i32, i32, i32) {
    %c0_i32 = arith.constant 0 : i32
    %c0_i32_0 = arith.constant 0 : i32
    %c0_i32_1 = arith.constant 0 : i32
    %c0_i32_2 = arith.constant 0 : i32
    return %c0_i32, %c0_i32_0, %c0_i32_1 : i32, i32, i32
  }
  func.func @transform_20(%arg0: i32, %arg1: i32) -> (i32, i32, i32) {
    %c0_i32 = arith.constant 0 : i32
    %c0_i32_0 = arith.constant 0 : i32
    %c0_i32_1 = arith.constant 0 : i32
    %c0_i32_2 = arith.constant 0 : i32
    return %c0_i32, %c0_i32_0, %c0_i32_1 : i32, i32, i32
  }
  func.func @transform_21(%arg0: i32, %arg1: i32) -> (i32, i32, i32) {
    %c0_i32 = arith.constant 0 : i32
    %c0_i32_0 = arith.constant 0 : i32
    %c0_i32_1 = arith.constant 0 : i32
    %c0_i32_2 = arith.constant 0 : i32
    return %c0_i32, %c0_i32_0, %c0_i32_1 : i32, i32, i32
  }
  func.func @transform_22(%arg0: i32, %arg1: i32) -> (i32, i32) {
    %c0_i32 = arith.constant 0 : i32
    %c0_i32_0 = arith.constant 0 : i32
    %c0_i32_1 = arith.constant 0 : i32
    return %c0_i32, %c0_i32_0 : i32, i32
  }
  func.func @transform_23(%arg0: i32, %arg1: i32) -> (i32, i32) {
    %c0_i32 = arith.constant 0 : i32
    %c0_i32_0 = arith.constant 0 : i32
    %c0_i32_1 = arith.constant 0 : i32
    return %c0_i32, %c0_i32_0 : i32, i32
  }
  func.func @transform_24(%arg0: i32, %arg1: i32) -> (i32, i32) {
    %c0_i32 = arith.constant 0 : i32
    %c0_i32_0 = arith.constant 0 : i32
    %c0_i32_1 = arith.constant 0 : i32
    return %c0_i32, %c0_i32_0 : i32, i32
  }
  func.func @transform_25(%arg0: i32, %arg1: i32) -> (i32, i32) {
    %c0_i32 = arith.constant 0 : i32
    %c0_i32_0 = arith.constant 0 : i32
    %c0_i32_1 = arith.constant 0 : i32
    return %c0_i32, %c0_i32_0 : i32, i32
  }
  func.func @transform_26(%arg0: i32, %arg1: i32) -> (i32, i32) {
    %c0_i32 = arith.constant 0 : i32
    %c0_i32_0 = arith.constant 0 : i32
    %c0_i32_1 = arith.constant 0 : i32
    return %c0_i32, %c0_i32_0 : i32, i32
  }
  func.func @transform_27(%arg0: i32, %arg1: i32) -> (i32, i32) {
    %c0_i32 = arith.constant 0 : i32
    %c0_i32_0 = arith.constant 0 : i32
    %c0_i32_1 = arith.constant 0 : i32
    return %c0_i32, %c0_i32_0 : i32, i32
  }
  func.func @transform_28(%arg0: i32, %arg1: i32) -> (i32, i32) {
    %c0_i32 = arith.constant 0 : i32
    %c0_i32_0 = arith.constant 0 : i32
    %c0_i32_1 = arith.constant 0 : i32
    return %c0_i32, %c0_i32_0 : i32, i32
  }
  func.func @transform_29(%arg0: i32, %arg1: i32) -> (i32, i32) {
    %c0_i32 = arith.constant 0 : i32
    %c0_i32_0 = arith.constant 0 : i32
    %c0_i32_1 = arith.constant 0 : i32
    return %c0_i32, %c0_i32_0 : i32, i32
  }
  func.func @transform_30(%arg0: i32, %arg1: i32) -> (i32, i32) {
    %c0_i32 = arith.constant 0 : i32
    %c0_i32_0 = arith.constant 0 : i32
    %c0_i32_1 = arith.constant 0 : i32
    return %c0_i32, %c0_i32_0 : i32, i32
  }
  func.func @transform_31(%arg0: i32, %arg1: i32) -> (i32, i32, i32) {
    %c0_i32 = arith.constant 0 : i32
    %c0_i32_0 = arith.constant 0 : i32
    return %arg0, %arg1, %c0_i32 : i32, i32, i32
  }
}

</mosaic_0001>

<bundles_post_ra>
// kernel: tpu_custom_call.1
= control target key start
LH: loop header
LB: loop body
LE: loop exit
PB: predicated region body
PF: predicated region fallthrough
CT: control target
= control target key end

     0   :  { %s5183_s6 = smov 1   ;;  %s5184_s10 = smov 2   ;;  %s5900_s0 = inlined_call_operand.smem [shape: u32[32], index: -1, kind: input, shape index: {}] }
   0x1   :  { %s5225_s5 = sld [smem:[%s5900_s0]]   ;;  %s5185_s14 = smov 3  }
   0x2   :  { %s5230_s9 = sld [smem:[%s5900_s0 + %s5183_s6]]   ;;  %s5186_s18 = smov 4  }
   0x3   :  { %s5235_s13 = sld [smem:[%s5900_s0 + %s5184_s10]]   ;;  %s5187_s22 = smov 5  }
   0x4   :  { %s5240_s17 = sld [smem:[%s5900_s0 + %s5185_s14]]   ;;  %s5188_s26 = smov 6  }
   0x5   :  { %s5245_s21 = sld [smem:[%s5900_s0 + %s5186_s18]]   ;;  %s5189_s30 = smov 7  }
   0x6   :  { %s5250_s25 = sld [smem:[%s5900_s0 + %s5187_s22]]   ;;  %s5190_s4 = smov 8  }
   0x7   :  { %5919 = sst [smem:[#allocation5_spill]] %s5225_s5  ;;  %s5191_s10 = smov 9  }
   0x8   :  { %5920 = sst [smem:[#allocation6_spill]] %s5230_s9  ;;  %s5192_s15 = smov 10  }
   0x9   :  { %5921 = sst [smem:[#allocation7_spill]] %s5235_s13  ;;  %s5193_s20 = smov 11  }
   0xa   :  { %s5255_s29 = sld [smem:[%s5900_s0 + %s5188_s26]]   ;;  %s5194_s26 = smov 12  }
   0xb   :  { %5922 = sst [smem:[#allocation8_spill]] %s5245_s21  ;;  %s5195_s1 = smov 13  }
   0xc   :  { %s5260_s3 = sld [smem:[%s5900_s0 + %s5189_s30]]   ;;  %s5196_s7 = smov 14  }
   0xd   :  { %s5265_s8 = sld [smem:[%s5900_s0 + %s5190_s4]]   ;;  %s5198_s22 = smov 16  }
   0xe   :  { %s5270_s14 = sld [smem:[%s5900_s0 + %s5191_s10]]   ;;  %s5199_s28 = smov 17  }
   0xf   :  { %s5275_s19 = sld [smem:[%s5900_s0 + %s5192_s15]]   ;;  %s5197_s15 = smov 15  }
  0x10   :  { %s5280_s24 = sld [smem:[%s5900_s0 + %s5193_s20]]  }
  0x11   :  { %s5285_s30 = sld [smem:[%s5900_s0 + %s5194_s26]]  }
  0x12   :  { %5923 = sst [smem:[#allocation9_spill]] %s5260_s3 }
  0x13   :  { %5924 = sst [smem:[#allocation10_spill]] %s5265_s8 }
  0x14   :  { %s5290_s6 = sld [smem:[%s5900_s0 + %s5195_s1]]  }
  0x15   :  { %s5295_s12 = sld [smem:[%s5900_s0 + %s5196_s7]]   ;;  %s5200_s7 = smov 18  }
  0x16   :  { %s5300_s20 = sld [smem:[%s5900_s0 + %s5197_s15]]   ;;  %s5201_s15 = smov 19  }
  0x17   :  { %s5305_s27 = sld [smem:[%s5900_s0 + %s5198_s22]]   ;;  %s5202_s22 = smov 20  }
  0x18   :  { %s5310_s4 = sld [smem:[%s5900_s0 + %s5199_s28]]   ;;  %s5203_s28 = smov 21  }
  0x19   :  { %s5315_s21 = sld [smem:[%s5900_s0 + %s5200_s7]]   ;;  %s5204_s7 = smov 22  }
  0x1a   :  { %5925 = sst [smem:[#allocation11_spill]] %s5290_s6 }
  0x1b   :  { %5926 = sst [smem:[#allocation12_spill]] %s5295_s12 }
  0x1c   :  { %s5320_s13 = sld [smem:[%s5900_s0 + %s5201_s15]]   ;;  %s5205_s15 = smov 23  }
  0x1d   :  { %5927 = sst [smem:[#allocation13_spill]] %s5305_s27 }
  0x1e   :  { %5928 = sst [smem:[#allocation14_spill]] %s5310_s4 }
  0x1f   :  { %5929 = sst [smem:[#allocation15_spill]] %s5315_s21 }
  0x20   :  { %s5325_s27 = sld [smem:[%s5900_s0 + %s5202_s22]]   ;;  %s5206_s22 = smov 24  }
  0x21   :  { %s5330_s4 = sld [smem:[%s5900_s0 + %s5203_s28]]   ;;  %s5207_s28 = smov 25  }
  0x22   :  { %5930 = sst [smem:[#allocation16_spill]] %s5320_s13 }
  0x23   :  { %s5335_s21 = sld [smem:[%s5900_s0 + %s5204_s7]]   ;;  %s5208_s7 = smov 26  }
  0x24   :  { %s5340_s13 = sld [smem:[%s5900_s0 + %s5205_s15]]   ;;  %s5209_s15 = smov 27  }
  0x26   :  { %5931 = sst [smem:[#allocation17_spill]] %s5325_s27 }
  0x27   :  { %5932 = sst [smem:[#allocation18_spill]] %s5330_s4 }
  0x28   :  { %s5345_s27 = sld [smem:[%s5900_s0 + %s5206_s22]]   ;;  %s5210_s22 = smov 28  }
  0x29   :  { %5933 = sst [smem:[#allocation19_spill]] %s5335_s21 }
  0x2a   :  { %5934 = sst [smem:[#allocation20_spill]] %s5340_s13 }
  0x2b   :  { %s5350_s4 = sld [smem:[%s5900_s0 + %s5207_s28]]   ;;  %s5211_s28 = smov 29  }
  0x2c   :  { %s5355_s21 = sld [smem:[%s5900_s0 + %s5208_s7]]   ;;  %s5212_s7 = smov 30  }
  0x2d   :  { %s5360_s13 = sld [smem:[%s5900_s0 + %s5209_s15]]   ;;  %s5213_s15 = smov 31  }
  0x2e   :  { %5935 = sst [smem:[#allocation21_spill]] %s5345_s27 }
  0x2f   :  { %s5365_s27 = sld [smem:[%s5900_s0 + %s5210_s22]]  }
  0x31   :  { %5936 = sst [smem:[#allocation22_spill]] %s5350_s4 }
  0x32   :  { %5937 = sst [smem:[#allocation23_spill]] %s5355_s21 }
  0x33   :  { %5938 = sst [smem:[#allocation24_spill]] %s5360_s13 }
  0x34   :  { %s5370_s4 = sld [smem:[%s5900_s0 + %s5211_s28]]  }
  0x35   :  { %s5375_s21 = sld [smem:[%s5900_s0 + %s5212_s7]]  }
  0x36   :  { %s5380_s13 = sld [smem:[%s5900_s0 + %s5213_s15]]  }
  0x3a   :  { %5939 = sst [smem:[#allocation25_spill]] %s5370_s4 }
  0x3c   :  { %5940 = sst [smem:[#allocation26_spill]] %s5380_s13 }
  0x3d   :  { %68 = vsyncpa [#allocation3], 0 }
  0x3e   :  { %70 = vsyncpa [#allocation3 + $0x1], 0  ;;  %s5382_s22 = smov 0   ;;  %s5384_s23 = smov 0  }
  0x3f   :  { %s5386_s26 = smov 0   ;;  %s5388_s28 = smov 0  }
  0x40   :  { %s5390_s1 = smov 0   ;;  %s5392_s2 = smov 0  }
  0x41 LB: > { %s5941_s8 = sld [smem:[#allocation10_spill]]  ;;  %s5942_s3 = sld [smem:[#allocation9_spill]]  ;;  %s5165_s23 = sphi %s5384_s23, %s5966_s23   ;;  %s5161_s22 = sphi %s5382_s22, %s5965_s22   ;;  %s5181_s2 = sphi %s5392_s2, %s76_s2   ;;  %s5177_s1 = sphi %s5390_s1, %s5969_s1   ;;  %s5173_s28 = sphi %s5388_s28, %s5968_s28   ;;  %s5169_s26 = sphi %s5386_s26, %s5967_s26  }
  0x42   : > { %s4286_s0 = sadd.s32 4294967295, %s5181_s2   ;;  %s4287_s7 = sadd.s32 4294967294, %s5181_s2  }
  0x43   : > { %s88_s10 = sadd.s32 1, %s5177_s1  ;;  %s777_s11 = sadd.s32 1, %s5169_s26 }
  0x44   : > { %p90_p0 = scmp.ge.s32.totalorder %s88_s10, 2  ;;  %p787_p1 = scmp.ne.s32.totalorder %s5169_s26, %s5165_s23 }
  0x45   : > { %p788_p2 = scmp.eq.s32.totalorder %s4286_s0, 1  ;;  %p793_p3 = scmp.ne.s32.totalorder %s5165_s23, %s5161_s22 }
  0x46   : > { %s5971_s10 = smov (%p90_p0, %s88_s10), 0  ;;  %p794_p5 = scmp.eq.s32.totalorder %s4287_s7, 1 }
  0x47   : > { %p5422_p4 = por %p788_p2, %p787_p1  ;;  %s772_s16 = ssub.s32 %s5177_s1, %s5971_s10 }
  0x48   : > { %p4290_p6 = scmp.ge.s32.totalorder %s5181_s2, 1  ;;  %p775_p7 = scmp.eq.s32.totalorder %s772_s16, 0 }
  0x49   : > { %p5429_p8 = por %p794_p5, %p793_p3  ;;  %p930_p9 = scmp.lt.s32.totalorder %s5181_s2, 3 }
  0x4a   : > { %s5435_s13 = scalar_select %p775_p7, %s5169_s26, %s777_s11  }
  0x4b   : > { %p931_p10 = pnand %p4290_p6, %p930_p9 }
  0x4c   : > { %v5011_v0 = vld [vmem:[%s5250_s25] sm:$0xff] (!%p931_p10)   ;;  %v5214_v1 = vmov (!%p931_p10), 0.0   ;;  %s5945_s5 = sld [smem:[#allocation5_spill]] (!%p931_p10)  ;;  %v5012_v2 = vld [vmem:[%s5250_s25 + $0x10] sm:$0xff] (!%p931_p10)   ;;  %v5013_v3 = vld [vmem:[%s5250_s25 + $0x8] sm:$0xff] (!%p931_p10)   ;;  %vm5215_vm0 = vmmov (!%p931_p10), 0  }
  0x4d   : > { %934 = sbr.rel (%p931_p10) target bundleno = 3911 (0xf47), region = 144  ;;  %4567 = vmatprep.subr.bf16.mxu0 (!%p931_p10), %v5214_v1  ;;  %4575 = vmatprep.subr.bf16.mxu1 (!%p931_p10), %v5214_v1  ;;  %p1030_p11 = scmp.lt.s32.totalorder (!%p931_p10), %s5173_s28, 1  ;;  %v5014_v4 = vld [vmem:[%s5250_s25 + $0x18] sm:$0xff] (!%p931_p10)   ;;  %v5015_v5 = vld [vmem:[%s5250_s25 + $0x20] sm:$0xff] (!%p931_p10)   ;;  %vm1164_vm1 = vcmask (!%p931_p10), 261120   ;;  %v5016_v7 = vld [vmem:[%s5250_s25 + $0x30] sm:$0xff] (!%p931_p10)  }
  0x4e   : > { %4568 = vmatpush3.bf16.msra.mxu0 (!%p931_p10), %v5011_v0  ;;  %4571 = vmatprep.mubr.msk.bf16.mxu0 (!%p931_p10), %vm5215_vm0, %v5214_v1  ;;  %s5946_s9 = sld [smem:[#allocation6_spill]] (!%p931_p10)  ;;  %v5017_v9 = vld [vmem:[%s5250_s25 + $0x28] sm:$0xff] (!%p931_p10)   ;;  %v5018_v10 = vld [vmem:[%s5250_s25 + $0x38] sm:$0xff] (!%p931_p10)   ;;  %v5019_v11 = vld [vmem:[%s5942_s3] sm:$0xff] (!%p931_p10)   ;;  %vm1844_vm2 = vcmask (!%p931_p10), 64512   ;;  %vm2084_vm3 = vcmask (!%p931_p10), 1043456  }
  0x4f   : > { %4576 = vmatpush3.bf16.msra.mxu1 (!%p931_p10), %v5012_v2  ;;  %4569 = vmatprep.subr.bf16.mxu0 (!%p931_p10), %v5214_v1  ;;  %v5020_v12 = vld [vmem:[%s5942_s3 + $0x10] sm:$0xff] (!%p931_p10)   ;;  %v5021_v14 = vld [vmem:[%s5942_s3 + $0x8] sm:$0xff] (!%p931_p10)   ;;  %v5022_v15 = vld [vmem:[%s5942_s3 + $0x18] sm:$0xff] (!%p931_p10)   ;;  %s5947_s6 = sld [smem:[#allocation11_spill]] (!%p931_p10)  ;;  %s5948_s12 = sld [smem:[#allocation12_spill]] (!%p931_p10)  ;;  %vm4046_vm4 = vcmask (!%p931_p10), 523264  }
  0x50   : > { %4577 = vmatprep.subr.bf16.mxu1 (!%p931_p10), %v5214_v1  ;;  %4579 = vmatprep.mubr.msk.bf16.mxu1 (!%p931_p10), %vm5215_vm0, %v5214_v1  ;;  %v5023_v16 = vld [vmem:[%s5942_s3 + $0x20] sm:$0xff] (!%p931_p10)   ;;  %v5024_v17 = vld [vmem:[%s5942_s3 + $0x30] sm:$0xff] (!%p931_p10)   ;;  %v5025_v19 = vld [vmem:[%s5942_s3 + $0x28] sm:$0xff] (!%p931_p10)   ;;  %s5963_s4 = sld [smem:[#allocation25_spill]] (!%p931_p10) }
  0x51   : > { %v5026_v20 = vld [vmem:[%s5942_s3 + $0x38] sm:$0xff] (!%p931_p10)   ;;  %v5027_v21 = vld [vmem:[%s5270_s14] sm:$0xff] (!%p931_p10)   ;;  %v5028_v22 = vld [vmem:[%s5270_s14 + $0x10] sm:$0xff] (!%p931_p10)  }
  0x52   : > { %4570 = vmatpush3.bf16.msra.mxu0 (!%p931_p10), %v5013_v3  ;;  %v5029_v23 = vld [vmem:[%s5270_s14 + $0x8] sm:$0xff] (!%p931_p10)   ;;  %v5030_v24 = vld [vmem:[%s5270_s14 + $0x18] sm:$0xff] (!%p931_p10)   ;;  %v5031_v25 = vld [vmem:[%s5270_s14 + $0x20] sm:$0xff] (!%p931_p10)  }
  0x53   : > { %4578 = vmatpush3.bf16.msra.mxu1 (!%p931_p10), %v5014_v4  ;;  %4583 = vmatprep.subr.bf16.mxu0 (!%p931_p10), %v5214_v1  ;;  %v5032_v26 = vld [vmem:[%s5270_s14 + $0x30] sm:$0xff] (!%p931_p10)   ;;  %v5033_v27 = vld [vmem:[%s5270_s14 + $0x28] sm:$0xff] (!%p931_p10)   ;;  %v5034_v28 = vld [vmem:[%s5270_s14 + $0x38] sm:$0xff] (!%p931_p10)  }
  0x54   : > { %s5451_s0 = scalar_select %p1030_p11, %s5173_s28, 1  ;;  %4591 = vmatprep.subr.bf16.mxu1 %v5214_v1  ;;  %v4312_v45 = vld [vmem:[%s5941_s8] ss:$0 sm:$0xff]  ;;  %v4313_v46 = vld [vmem:[%s5941_s8 + $0x1] ss:$0 sm:$0xff] }
  0x55   : > { %v4296_v47 = vld [vmem:[%s5255_s29] ss:$0 sm:$0xff]  ;;  %v4297_v48 = vld [vmem:[%s5255_s29 + $0x1] ss:$0 sm:$0xff]  ;;  %v4314_v2 = vld [vmem:[%s5941_s8 + $0x2] ss:$0 sm:$0xff] }
  0x56   : > { %s5454_s7 = sshll.u32 %s5451_s0, 3 }
  0x57   : > { %s1036_s11 = scalar_lea.vmem %s5945_s5, %s5454_s7  ;;  %s1040_s16 = scalar_lea.vmem %s5946_s9, %s5454_s7 }
  0x58   : > { %v5460_v6 = vld [vmem:[%s1036_s11] sm:$0xff]  ;;  %s4295_s11 = sshll.u32 %s5451_s0, 2  ;;  %s5955_s5 = sld [smem:[#allocation8_spill]] }
  0x59   : > { %v1126_v8 = vpack.c.bf16 %v5460_v6, %v5460_v6  ;;  %v1057_v13 = vld [vmem:[%s1040_s16] sm:$0xff]  ;;  %s1051_s16 = scalar_lea.vmem %s5240_s17, %s4295_s11  ;;  %s5949_s11 = sld [smem:[#allocation14_spill]] }
  0x5a   : > { %v1127_v18 = vpack.c.bf16 %v1057_v13, %v1057_v13 }
  0x5b   : > { %4572 = vmatmul.mubr.msk.bf16.vlgmr.msra.gmra.mrb[0].mxu0 %vm1164_vm1, %v1126_v8  ;;  %4580 = vmatmul.mubr.msk.bf16.vlgmr.msra.gmra.mrb[0].mxu1 %vm1164_vm1, %v1126_v8 }
  0x5c   : > { %4584 = vmatpush3.bf16.msra.mxu0 %v5015_v5  ;;  %4592 = vmatpush3.bf16.msra.mxu1 %v5016_v7  ;;  %v4315_v5 = vld [vmem:[%s5941_s8 + $0x3] ss:$0 sm:$0xff]  ;;  %v4298_v7 = vld [vmem:[%s5255_s29 + $0x2] ss:$0 sm:$0xff] }
  0x5d   : > { %4585 = vmatprep.subr.bf16.mxu0 %v5214_v1  ;;  %4593 = vmatprep.subr.bf16.mxu1 %v5214_v1 }
  0x5e   : > { %4587 = vmatprep.mubr.msk.bf16.mxu0 %vm5215_vm0, %v5214_v1  ;;  %4595 = vmatprep.mubr.msk.bf16.mxu1 %vm5215_vm0, %v5214_v1 }
  0x60   : > { %4586 = vmatpush3.bf16.msra.mxu0 %v5017_v9  ;;  %4594 = vmatpush3.bf16.msra.mxu1 %v5018_v10 }
  0x61   : > { %4599 = vmatprep.subr.bf16.mxu0 %v5214_v1  ;;  %4607 = vmatprep.subr.bf16.mxu1 %v5214_v1 }
  0x63   : > { %4588 = vmatmul.mubr.msk.bf16.vlgmr.msra.gmra.mrb[4].mxu0 %vm1164_vm1, %v1126_v8  ;;  %4596 = vmatmul.mubr.msk.bf16.vlgmr.msra.gmra.mrb[4].mxu1 %vm1164_vm1, %v1126_v8  ;;  %v4299_v8 = vld [vmem:[%s5255_s29 + $0x3] ss:$0 sm:$0xff] }
  0x64   : > { %4600 = vmatpush3.bf16.msra.mxu0 %v5019_v11  ;;  %4608 = vmatpush3.bf16.msra.mxu1 %v5020_v12 }
  0x65   : > { %4601 = vmatprep.subr.bf16.mxu0 %v5214_v1  ;;  %4609 = vmatprep.subr.bf16.mxu1 %v5214_v1 }
  0x66   : > { %4603 = vmatprep.mubr.msk.bf16.mxu0 %vm5215_vm0, %v5214_v1  ;;  %4611 = vmatprep.mubr.msk.bf16.mxu1 %vm5215_vm0, %v5214_v1 }
  0x68   : > { %4602 = vmatpush3.bf16.msra.mxu0 %v5021_v14  ;;  %4610 = vmatpush3.bf16.msra.mxu1 %v5022_v15 }
  0x69   : > { %4615 = vmatprep.subr.bf16.mxu0 %v5214_v1  ;;  %4623 = vmatprep.subr.bf16.mxu1 %v5214_v1 }
  0x6b   : > { %4604 = vmatmul.mubr.msk.bf16.vlgmr.msra.gmra.mrb[8].mxu0 %vm1164_vm1, %v1127_v18  ;;  %4612 = vmatmul.mubr.msk.bf16.vlgmr.msra.gmra.mrb[8].mxu1 %vm1164_vm1, %v1127_v18 }
  0x6c   : > { %4616 = vmatpush3.bf16.msra.mxu0 %v5023_v16  ;;  %4624 = vmatpush3.bf16.msra.mxu1 %v5024_v17 }
  0x6d   : > { %4617 = vmatprep.subr.bf16.mxu0 %v5214_v1  ;;  %4625 = vmatprep.subr.bf16.mxu1 %v5214_v1 }
  0x6e   : > { %4619 = vmatprep.mubr.msk.bf16.mxu0 %vm5215_vm0, %v5214_v1  ;;  %4627 = vmatprep.mubr.msk.bf16.mxu1 %vm5215_vm0, %v5214_v1 }
  0x70   : > { %4618 = vmatpush3.bf16.msra.mxu0 %v5025_v19  ;;  %4626 = vmatpush3.bf16.msra.mxu1 %v5026_v20 }
  0x71   : > { %4631 = vmatprep.subr.bf16.mxu0 %v5214_v1  ;;  %4639 = vmatprep.subr.bf16.mxu1 %v5214_v1 }
  0x73   : > { %4620 = vmatmul.mubr.msk.bf16.vlgmr.msra.gmra.mrb[12].mxu0 %vm1164_vm1, %v1127_v18  ;;  %4628 = vmatmul.mubr.msk.bf16.vlgmr.msra.gmra.mrb[12].mxu1 %vm1164_vm1, %v1127_v18 }
  0x74   : > { %4632 = vmatpush3.bf16.msra.mxu0 %v5027_v21  ;;  %4635 = vmatprep.mubr.msk.bf16.mxu0 %vm5215_vm0, %v5214_v1 }
  0x75   : > { %4633 = vmatprep.subr.bf16.mxu0 %v5214_v1  ;;  %4643 = vmatprep.mubr.msk.bf16.mxu1 %vm5215_vm0, %v5214_v1 }
  0x76   : > { %4640 = vmatpush3.bf16.msra.mxu1 %v5028_v22 }
  0x77   : > { %4641 = vmatprep.subr.bf16.mxu1 %v5214_v1 }
  0x78   : > { %4634 = vmatpush3.bf16.msra.mxu0 %v5029_v23 }
  0x79   : > { %4647 = vmatprep.subr.bf16.mxu0 %v5214_v1 }
  0x7a   : > { %4642 = vmatpush3.bf16.msra.mxu1 %v5030_v24 }
  0x7b   : > { %4636 = vmatmul.mubr.msk.bf16.vlgmr.msra.gmra.mrb[16].mxu0 %vm1164_vm1, %v1127_v18  ;;  %4655 = vmatprep.subr.bf16.mxu1 %v5214_v1 }
  0x7c   : > { %4651 = vmatprep.mubr.msk.bf16.mxu0 %vm5215_vm0, %v5214_v1  ;;  %4648 = vmatpush3.bf16.msra.mxu0 %v5031_v25 }
  0x7d   : > { %4644 = vmatmul.mubr.msk.bf16.vlgmr.msra.gmra.mrb[16].mxu1 %vm1164_vm1, %v1127_v18  ;;  %4649 = vmatprep.subr.bf16.mxu0 %v5214_v1 }
  0x7e   : > { %4656 = vmatpush3.bf16.msra.mxu1 %v5032_v26  ;;  %4659 = vmatprep.mubr.msk.bf16.mxu1 %vm5215_vm0, %v5214_v1 }
  0x7f   : > { %4657 = vmatprep.subr.bf16.mxu1 %v5214_v1 }
  0x80   : > { %4650 = vmatpush3.bf16.msra.mxu0 %v5033_v27 }
  0x81   : > { %4663 = vmatprep.subr.bf16.mxu0 %v5214_v1 }
  0x82   : > { %4658 = vmatpush3.bf16.msra.mxu1 %v5034_v28 }
  0x83   : > { %4669 = vmatprep.subr.bf16.mxu1 %v5214_v1  ;;  %4652 = vmatmul.mubr.msk.bf16.vlgmr.msra.gmra.mrb[20].mxu0 %vm1164_vm1, %v1127_v18 }
  0x84   : > { %4665 = vmatprep.mubr.msk.bf16.mxu0 %vm5215_vm0, %v5214_v1 }
  0x85   : > { %4660 = vmatmul.mubr.msk.bf16.vlgmr.msra.gmra.mrb[20].mxu1 %vm1164_vm1, %v1127_v18 }
  0x86   : > { %4671 = vmatprep.mubr.msk.bf16.mxu1 %vm5215_vm0, %v5214_v1 }
 0x12e   : > { %v1202_v29 = vpop.f32.mrb[0].mxu0  ;;  %v1254_v30 = vpop.f32.mrb[0].mxu1 }
 0x12f   : > { %v4573_v31 = vpop.f32.mrb[1].mxu0  ;;  %v4581_v32 = vpop.f32.mrb[1].mxu1  ;;  %v1203_v55 = vadd.f32 %v4296_v47, %v1202_v29  ;;  %v1255_v56 = vadd.f32 %v4297_v48, %v1254_v30 }
 0x130   : > { %v1205_v33 = vpop.f32.mrb[2].mxu0  ;;  %v1257_v34 = vpop.f32.mrb[2].mxu1  ;;  %v4328_v31 = vld [vmem:[%s5275_s19] ss:$0 sm:$0xff] }
 0x131   : > { %v4574_v35 = vpop.f32.mrb[3].mxu0  ;;  %v4582_v36 = vpop.f32.mrb[3].mxu1  ;;  %v1831_v3 = vmul.f32 0.35355338, %v1203_v55  ;;  %v1832_v4 = vmul.f32 0.35355338, %v1255_v56 }
 0x132   : > { %v4329_v33 = vld [vmem:[%s5275_s19 + $0x1] ss:$0 sm:$0xff] }
 0x133   : > { %v1835_v15 = vpack.c.bf16 %v1831_v3, %v1831_v3  ;;  %v1836_v16 = vpack.c.bf16 %v1832_v4, %v1832_v4  ;;  %v1059_v55 = vld [vmem:[%s1051_s16] sm:$0xf]  ;;  %s5950_s16 = sld [smem:[#allocation7_spill]] }
 0x134   : > { %v1843_v56 = vunpack.c.l.bf16 %v1059_v55 }
 0x136   : > { %v1306_v37 = vpop.f32.mrb[4].mxu0  ;;  %v1358_v38 = vpop.f32.mrb[4].mxu1 }
 0x137   : > { %v4589_v39 = vpop.f32.mrb[5].mxu0  ;;  %v4597_v40 = vpop.f32.mrb[5].mxu1  ;;  %v1307_v19 = vadd.f32 %v4298_v7, %v1306_v37  ;;  %v1359_v20 = vadd.f32 %v4299_v8, %v1358_v38 }
 0x138   : > { %v1309_v41 = vpop.f32.mrb[6].mxu0  ;;  %v1361_v42 = vpop.f32.mrb[6].mxu1 }
 0x139   : > { %v4590_v43 = vpop.f32.mrb[7].mxu0  ;;  %v4598_v44 = vpop.f32.mrb[7].mxu1  ;;  %v1833_v27 = vmul.f32 0.35355338, %v1307_v19  ;;  %v1834_v28 = vmul.f32 0.35355338, %v1359_v20  ;;  %s1044_s3 = scalar_lea.vmem %s5950_s16, %s5454_s7 }
 0x13a   : > { %s5952_s7 = sld [smem:[#allocation15_spill]]  ;;  %s5953_s16 = sld [smem:[#allocation13_spill]] }
 0x13b   : > { %v1837_v29 = vpack.c.bf16 %v1833_v27, %v1833_v27  ;;  %v1838_v30 = vpack.c.bf16 %v1834_v28, %v1834_v28 }
 0x13e   : > { %v1437_v49 = vpop.f32.mrb[8].mxu0  ;;  %v1489_v50 = vpop.f32.mrb[8].mxu1 }
 0x13f   : > { %v1438_v51 = vadd.f32 %v4312_v45, %v1437_v49  ;;  %v1490_v52 = vadd.f32 %v4313_v46, %v1489_v50  ;;  %v4605_v53 = vpop.f32.mrb[9].mxu0  ;;  %v4613_v54 = vpop.f32.mrb[9].mxu1 }
 0x140   : > { %v1440_v57 = vpop.f32.mrb[10].mxu0  ;;  %v1492_v58 = vpop.f32.mrb[10].mxu1 }
 0x141   : > { %v1839_v59 = vpack.c.bf16 %v1438_v51, %v1438_v51  ;;  %v1840_v60 = vpack.c.bf16 %v1490_v52, %v1490_v52  ;;  %v4606_v61 = vpop.f32.mrb[11].mxu0  ;;  %v4614_v62 = vpop.f32.mrb[11].mxu1 }
 0x143   : > { %v1849_v63 = vsel %vm1844_vm2, %v1839_v59, 0  ;;  %v1895_v0 = vsel %vm1844_vm2, %v1840_v60, 0 }
 0x144   : > { %4664 = vmatpush3.bf16.xpose.msra.mxu0 %v1849_v63  ;;  %4670 = vmatpush3.bf16.xpose.msra.mxu1 %v1895_v0 }
 0x145   : > { %4675 = vmatprep.subr.bf16.mxu0 %v5214_v1  ;;  %4681 = vmatprep.subr.bf16.mxu1 %v5214_v1 }
 0x146   : > { %v1541_v9 = vpop.f32.mrb[12].mxu0  ;;  %v1593_v10 = vpop.f32.mrb[12].mxu1 }
 0x147   : > { %v1542_v11 = vadd.f32 %v4314_v2, %v1541_v9  ;;  %v1594_v12 = vadd.f32 %v4315_v5, %v1593_v10  ;;  %v4621_v13 = vpop.f32.mrb[13].mxu0  ;;  %v4629_v14 = vpop.f32.mrb[13].mxu1 }
 0x148   : > { %v1544_v17 = vpop.f32.mrb[14].mxu0  ;;  %v1596_v18 = vpop.f32.mrb[14].mxu1 }
 0x149   : > { %v1841_v21 = vpack.c.bf16 %v1542_v11, %v1542_v11  ;;  %v1842_v22 = vpack.c.bf16 %v1594_v12, %v1594_v12  ;;  %v4622_v23 = vpop.f32.mrb[15].mxu0  ;;  %v4630_v24 = vpop.f32.mrb[15].mxu1 }
 0x14b   : > { %v1941_v25 = vsel %vm1844_vm2, %v1841_v21, 0  ;;  %v1987_v26 = vsel %vm1844_vm2, %v1842_v22, 0  ;;  %4666 = vmatmul.mubr.msk.bf16.vlgmr.msra.gmra.mrb[24].mxu0 %vm1844_vm2, %v1835_v15  ;;  %4672 = vmatmul.mubr.msk.bf16.vlgmr.msra.gmra.mrb[24].mxu1 %vm1844_vm2, %v1836_v16 }
 0x14c   : > { %4676 = vmatpush3.bf16.xpose.msra.mxu0 %v1941_v25  ;;  %4682 = vmatpush3.bf16.xpose.msra.mxu1 %v1987_v26 }
 0x14d   : > { %4677 = vmatprep.mubr.msk.bf16.mxu0 %vm5215_vm0, %v5214_v1  ;;  %4683 = vmatprep.mubr.msk.bf16.mxu1 %vm5215_vm0, %v5214_v1 }
 0x14e   : > { %4687 = vmatprep.subr.bf16.mxu0 %v5214_v1  ;;  %4693 = vmatprep.subr.bf16.mxu1 %v5214_v1  ;;  %v1669_v32 = vpop.f32.mrb[16].mxu0 }
 0x14f   : > { %v1670_v34 = vadd.f32 %v4328_v31, %v1669_v32  ;;  %v4637_v35 = vpop.f32.mrb[17].mxu0 }
 0x150   : > { %v1672_v36 = vpop.f32.mrb[18].mxu0  ;;  %v1721_v37 = vpop.f32.mrb[16].mxu1 }
 0x151   : > { %v2077_v38 = vpack.c.bf16 %v1670_v34, %v1670_v34  ;;  %v4638_v39 = vpop.f32.mrb[19].mxu0  ;;  %v1722_v40 = vadd.f32 %v4329_v33, %v1721_v37  ;;  %v4645_v41 = vpop.f32.mrb[17].mxu1 }
 0x152   : > { %v1724_v42 = vpop.f32.mrb[18].mxu1  ;;  %v4330_v41 = vld [vmem:[%s5275_s19 + $0x2] ss:$0 sm:$0xff] }
 0x153   : > { %4678 = vmatmul.mubr.msk.bf16.vlgmr.msra.gmra.mrb[28].mxu0 %vm1844_vm2, %v1837_v29  ;;  %4684 = vmatmul.mubr.msk.bf16.vlgmr.msra.gmra.mrb[28].mxu1 %vm1844_vm2, %v1838_v30  ;;  %v2086_v43 = vsel %vm2084_vm3, %v2077_v38, 0  ;;  %v2078_v44 = vpack.c.bf16 %v1722_v40, %v1722_v40  ;;  %v4646_v45 = vpop.f32.mrb[19].mxu1 }
 0x154   : > { %4689 = vmatprep.mubr.msk.bf16.mxu0 %vm5215_vm0, %v5214_v1  ;;  %4695 = vmatprep.mubr.msk.bf16.mxu1 %vm5215_vm0, %v5214_v1 }
 0x155   : > { %4688 = vmatpush3.bf16.msra.mxu0 %v2086_v43  ;;  %v2132_v46 = vsel %vm2084_vm3, %v2078_v44, 0  ;;  %v4331_v44 = vld [vmem:[%s5275_s19 + $0x3] ss:$0 sm:$0xff] }
 0x156   : > { %4699 = vmatprep.subr.bf16.mxu0 %v5214_v1  ;;  %4694 = vmatpush3.bf16.msra.mxu1 %v2132_v46  ;;  %v5576_v47 = vpop.f32.mrb[20].mxu0 }
 0x157   : > { %4705 = vmatprep.subr.bf16.mxu1 %v5214_v1  ;;  %v4653_v49 = vpop.f32.mrb[21].mxu0  ;;  %v1774_v42 = vadd.f32 %v4330_v41, %v5576_v47 }
 0x158   : > { %v5578_v48 = vpop.f32.mrb[20].mxu1  ;;  %v1776_v51 = vpop.f32.mrb[22].mxu0 }
 0x159   : > { %v4661_v50 = vpop.f32.mrb[21].mxu1  ;;  %v4654_v53 = vpop.f32.mrb[23].mxu0  ;;  %v2079_v46 = vpack.c.bf16 %v1774_v42, %v1774_v42  ;;  %v1826_v49 = vadd.f32 %v4331_v44, %v5578_v48  ;;  %v1121_v48 = vld [vmem:[%s5280_s24] sm:$0xf] }
 0x15a   : > { %v1828_v52 = vpop.f32.mrb[22].mxu1 }
 0x15b   : > { %v4662_v54 = vpop.f32.mrb[23].mxu1  ;;  %v2080_v55 = vpack.c.bf16 %v1826_v49, %v1826_v49  ;;  %v4356_v49 = vld [vmem:[%s5285_s30] ss:$0 sm:$0xff] }
 0x15c   : > { %v2178_v54 = vsel %vm2084_vm3, %v2079_v46, 0 }
 0x21e   : > { %v1885_v57 = vpop.f32.mrb[24].mxu0  ;;  %v1931_v58 = vpop.f32.mrb[24].mxu1 }
 0x21f   : > { %v1886_v59 = vadd.f32 %v1885_v57, %v1843_v56  ;;  %v4667_v60 = vpop.f32.mrb[25].mxu0  ;;  %v4673_v61 = vpop.f32.mrb[25].mxu1  ;;  %v1932_v0 = vadd.f32 %v1931_v58, %v1843_v56  ;;  %v2224_v58 = vsel %vm2084_vm3, %v2080_v55, 0 }
 0x220   : > { %v1888_v62 = vpop.f32.mrb[26].mxu0  ;;  %v1934_v63 = vpop.f32.mrb[26].mxu1  ;;  %v2274_v61 = vsel %vm2084_vm3, %v1121_v48, 0 }
 0x221   : > { %v4668_v2 = vpop.f32.mrb[27].mxu0  ;;  %v4674_v3 = vpop.f32.mrb[27].mxu1  ;;  %v2029_v4 = vsel %vm1844_vm2, %v1886_v59, -inf  ;;  %v2032_v5 = vsel %vm1844_vm2, %v1932_v0, -inf }
 0x222   : > { %2030 = vmax.xlane.f32.xlu0 %v2029_v4  ;;  %v1122_v2 = vld [vmem:[%s5280_s24 + $0x4] sm:$0xf]  ;;  %v1123_v4 = vld [vmem:[%s5280_s24 + $0x8] sm:$0xf] }
 0x223   : > { %v2320_v3 = vsel %vm2084_vm3, %v1122_v2, 0 }
 0x226   : > { %v2023_v7 = vpop.f32.mrb[28].mxu1  ;;  %2033 = vmax.xlane.f32.xlu0 %v2032_v5  ;;  %v1977_v8 = vpop.f32.mrb[28].mxu0 }
 0x227   : > { %v1978_v9 = vadd.f32 %v1977_v8, %v1843_v56  ;;  %v4679_v10 = vpop.f32.mrb[29].mxu0  ;;  %v4685_v11 = vpop.f32.mrb[29].mxu1  ;;  %v2024_v14 = vadd.f32 %v2023_v7, %v1843_v56 }
 0x228   : > { %v1980_v12 = vpop.f32.mrb[30].mxu0  ;;  %v2026_v13 = vpop.f32.mrb[30].mxu1  ;;  %v1124_v11 = vld [vmem:[%s5280_s24 + $0xc] sm:$0xf] }
 0x229   : > { %v4680_v15 = vpop.f32.mrb[31].mxu0  ;;  %v4686_v16 = vpop.f32.mrb[31].mxu1  ;;  %v2035_v17 = vsel %vm1844_vm2, %v1978_v9, -inf  ;;  %v2038_v18 = vsel %vm1844_vm2, %v2024_v14, -inf }
 0x22a   : > { %2036 = vmax.xlane.f32.xlu1 %v2035_v17  ;;  %v2412_v16 = vsel %vm2084_vm3, %v1124_v11, 0  ;;  %v5039_v11 = vld [vmem:[%s5300_s20 + $0x20] sm:$0xff]  }
 0x22e   : > { %2039 = vmax.xlane.f32.xlu1 %v2038_v18 }
 0x2af   : > { %v2031_v19 = vpop.xlane.xlu0 %2030 }
 0x2b0   : > { %v2041_v20 = vsub.f32 %v1886_v59, %v2031_v19 }
 0x2b2   : > { %v2045_v21 = vmul.f32 1.442695, %v2041_v20 }
 0x2b3   : > { %v2034_v22 = vpop.xlane.xlu0 %2033 }
 0x2b4   : > { %5065 = vpow2.f32 %v2045_v21  ;;  %v2042_v23 = vsub.f32 %v1932_v0, %v2034_v22 }
 0x2b6   : > { %v2047_v24 = vmul.f32 1.442695, %v2042_v23 }
 0x2b7   : > { %v2037_v25 = vpop.xlane.xlu1 %2036 }
 0x2b8   : > { %5067 = vpow2.f32 %v2047_v24  ;;  %v2043_v26 = vsub.f32 %v1978_v9, %v2037_v25  ;;  %v2366_v9 = vsel %vm2084_vm3, %v1123_v4, 0 }
 0x2ba   : > { %v2049_v27 = vmul.f32 1.442695, %v2043_v26 }
 0x2bb   : > { %v2040_v28 = vpop.xlane.xlu1 %2039 }
 0x2bc   : > { %5069 = vpow2.f32 %v2049_v27  ;;  %v2044_v29 = vsub.f32 %v2024_v14, %v2040_v28 }
 0x2be   : > { %v5066_v30 = vpop.eup %5065  ;;  %v2051_v31 = vmul.f32 1.442695, %v2044_v29 }
 0x2bf   : > { %v2053_v32 = vsel %vm1844_vm2, %v5066_v30, 0.0 }
 0x2c0   : > { %5071 = vpow2.f32 %v2051_v31  ;;  %2054 = vadd.xlane.f32.xlu0 %v2053_v32 }
 0x2c2   : > { %v5068_v33 = vpop.eup %5067 }
 0x2c3   : > { %v2056_v34 = vsel %vm1844_vm2, %v5068_v33, 0.0 }
 0x2c4   : > { %2057 = vadd.xlane.f32.xlu1 %v2056_v34 }
 0x2c6   : > { %v5070_v35 = vpop.eup %5069 }
 0x2c7   : > { %v2059_v36 = vsel %vm1844_vm2, %v5070_v35, 0.0 }
 0x2c8   : > { %2060 = vadd.xlane.f32.xlu0 %v2059_v36 }
 0x2ca   : > { %v5072_v37 = vpop.eup %5071 }
 0x2cb   : > { %v2062_v38 = vsel %vm1844_vm2, %v5072_v37, 0.0 }
 0x2cc   : > { %2063 = vadd.xlane.f32.xlu1 %v2062_v38 }
 0x34d   : > { %v2055_v39 = vpop.xlane.xlu0 %2054 }
 0x34e   : > { %5073 = vrcp.f32 %v2055_v39 }
 0x351   : > { %v2058_v40 = vpop.xlane.xlu1 %2057 }
 0x352   : > { %5075 = vrcp.f32 %v2058_v40 }
 0x355   : > { %v2061_v43 = vpop.xlane.xlu0 %2060 }
 0x356   : > { %5077 = vrcp.f32 %v2061_v43 }
 0x358   : > { %v5074_v45 = vpop.eup %5073 }
 0x359   : > { %v2069_v50 = vmul.f32 %v5074_v45, %v5066_v30  ;;  %v2064_v51 = vpop.xlane.xlu1 %2063 }
 0x35a   : > { %5079 = vrcp.f32 %v2064_v51 }
 0x35b   : > { %v2073_v52 = vpack.c.bf16 %v2069_v50, %v2069_v50 }
 0x35c   : > { %v5076_v53 = vpop.eup %5075 }
 0x35d   : > { %v2070_v56 = vmul.f32 %v5076_v53, %v5068_v33  ;;  %4690 = vmatmul.mubr.msk.bf16.vlgmr.msra.gmra.mrb[32].mxu0 %vm1844_vm2, %v2073_v52 }
 0x35e   : > { %4700 = vmatpush3.bf16.msra.mxu0 %v2178_v54  ;;  %4701 = vmatprep.mubr.msk.bf16.mxu0 %vm5215_vm0, %v5214_v1 }
 0x35f   : > { %v2074_v47 = vpack.c.bf16 %v2070_v56, %v2070_v56  ;;  %4711 = vmatprep.subr.bf16.mxu0 %v5214_v1 }
 0x360   : > { %v5078_v57 = vpop.eup %5077 }
 0x361   : > { %v2071_v59 = vmul.f32 %v5078_v57, %v5070_v35  ;;  %4696 = vmatmul.mubr.msk.bf16.vlgmr.msra.gmra.mrb[32].mxu1 %vm1844_vm2, %v2074_v47 }
 0x362   : > { %4706 = vmatpush3.bf16.msra.mxu1 %v2224_v58  ;;  %4707 = vmatprep.mubr.msk.bf16.mxu1 %vm5215_vm0, %v5214_v1 }
 0x363   : > { %v2075_v60 = vpack.c.bf16 %v2071_v59, %v2071_v59  ;;  %4717 = vmatprep.subr.bf16.mxu1 %v5214_v1 }
 0x364   : > { %v5080_v62 = vpop.eup %5079 }
 0x365   : > { %v2072_v63 = vmul.f32 %v5080_v62, %v5072_v37  ;;  %4702 = vmatmul.mubr.msk.bf16.vlgmr.msra.gmra.mrb[36].mxu0 %vm1844_vm2, %v2075_v60  ;;  %v5036_v62 = vld [vmem:[%s5300_s20 + $0x10] sm:$0xff]  }
 0x366   : > { %4712 = vmatpush3.bf16.msra.mxu0 %v2274_v61  ;;  %4713 = vmatprep.mubr.msk.bf16.mxu0 %vm5215_vm0, %v5214_v1  ;;  %v5035_v61 = vld [vmem:[%s5300_s20] sm:$0xff]  }
 0x367   : > { %v2076_v0 = vpack.c.bf16 %v2072_v63, %v2072_v63  ;;  %4723 = vmatprep.subr.bf16.mxu0 %v5214_v1  ;;  %v5037_v63 = vld [vmem:[%s5300_s20 + $0x8] sm:$0xff]  }
 0x369   : > { %4708 = vmatmul.mubr.msk.bf16.vlgmr.msra.gmra.mrb[36].mxu1 %vm1844_vm2, %v2076_v0  ;;  %v5038_v0 = vld [vmem:[%s5300_s20 + $0x18] sm:$0xff]  }
 0x36a   : > { %4719 = vmatprep.mubr.msk.bf16.mxu1 %vm5215_vm0, %v5214_v1  ;;  %4718 = vmatpush3.bf16.msra.mxu1 %v2320_v3 }
 0x36b   : > { %4729 = vmatprep.subr.bf16.mxu1 %v5214_v1 }
 0x430   : > { %v2122_v5 = vpop.f32.mrb[32].mxu0 }
 0x431   : > { %v2266_v7 = vpack.c.bf16 %v2122_v5, %v2122_v5  ;;  %v4691_v8 = vpop.f32.mrb[33].mxu0  ;;  %v4357_v5 = vld [vmem:[%s5947_s6] ss:$0 sm:$0xff]  ;;  %s1054_s6 = scalar_lea.vmem %s5955_s5, %s5451_s0  ;;  %s5956_s5 = sld [smem:[#allocation18_spill]] }
 0x432   : > { %v2125_v10 = vpop.f32.mrb[34].mxu0  ;;  %v4358_v8 = vld [vmem:[%s5948_s12] ss:$0 sm:$0xff]  ;;  %s5958_s0 = sld [smem:[#allocation22_spill]] }
 0x433   : > { %v4692_v12 = vpop.f32.mrb[35].mxu0  ;;  %4714 = vmatmul.mubr.msk.bf16.vlgmr.msra.gmra.mrb[40].mxu0 %vm1844_vm2, %v2266_v7 }
 0x434   : > { %v2168_v13 = vpop.f32.mrb[32].mxu1  ;;  %4724 = vmatpush3.bf16.msra.mxu0 %v2366_v9  ;;  %4725 = vmatprep.mubr.msk.bf16.mxu0 %vm5215_vm0, %v5214_v1  ;;  %v5040_v12 = vld [vmem:[%s5300_s20 + $0x30] sm:$0xff]  }
 0x435   : > { %v2267_v14 = vpack.c.bf16 %v2168_v13, %v2168_v13  ;;  %v4697_v15 = vpop.f32.mrb[33].mxu1  ;;  %4735 = vmatprep.subr.bf16.mxu0 %v5214_v1 }
 0x436   : > { %v2171_v17 = vpop.f32.mrb[34].mxu1  ;;  %v5042_v15 = vld [vmem:[%s5300_s20 + $0x38] sm:$0xff]  }
 0x437   : > { %v4698_v18 = vpop.f32.mrb[35].mxu1  ;;  %4720 = vmatmul.mubr.msk.bf16.vlgmr.msra.gmra.mrb[40].mxu1 %vm1844_vm2, %v2267_v14  ;;  %v5041_v14 = vld [vmem:[%s5300_s20 + $0x28] sm:$0xff]   ;;  %v5044_v17 = vld [vmem:[%s5949_s11 + $0x10] sm:$0xff]  }
 0x438   : > { %v2214_v19 = vpop.f32.mrb[36].mxu0  ;;  %4730 = vmatpush3.bf16.msra.mxu1 %v2412_v16  ;;  %4731 = vmatprep.mubr.msk.bf16.mxu1 %vm5215_vm0, %v5214_v1  ;;  %v5043_v16 = vld [vmem:[%s5949_s11] sm:$0xff]  }
 0x439   : > { %v2268_v20 = vpack.c.bf16 %v2214_v19, %v2214_v19  ;;  %v4703_v21 = vpop.f32.mrb[37].mxu0  ;;  %4743 = vmatprep.subr.bf16.mxu1 %v5214_v1  ;;  %v1058_v18 = vld [vmem:[%s1044_s3] sm:$0xff]  ;;  %v5045_v19 = vld [vmem:[%s5949_s11 + $0x8] sm:$0xff]   ;;  %s5951_s3 = sld [smem:[#allocation16_spill]] }
 0x43a   : > { %v2217_v22 = vpop.f32.mrb[38].mxu0  ;;  %v2565_v21 = vpack.c.bf16 %v1058_v18, %v1058_v18 }
 0x43b   : > { %v4704_v23 = vpop.f32.mrb[39].mxu0  ;;  %4726 = vmatmul.mubr.msk.bf16.vlgmr.msra.gmra.mrb[44].mxu0 %vm1844_vm2, %v2268_v20  ;;  %v5046_v20 = vld [vmem:[%s5949_s11 + $0x18] sm:$0xff]   ;;  %v5047_v22 = vld [vmem:[%s5949_s11 + $0x20] sm:$0xff]  }
 0x43c   : > { %v2260_v24 = vpop.f32.mrb[36].mxu1  ;;  %4739 = vmatprep.mubr.msk.bf16.mxu0 %vm5215_vm0, %v5214_v1  ;;  %4736 = vmatpush3.bf16.msra.mxu0 %v5035_v61  ;;  %v5048_v23 = vld [vmem:[%s5949_s11 + $0x30] sm:$0xff]  }
 0x43d   : > { %v2269_v25 = vpack.c.bf16 %v2260_v24, %v2260_v24  ;;  %v4709_v26 = vpop.f32.mrb[37].mxu1  ;;  %4737 = vmatprep.subr.bf16.mxu0 %v5214_v1  ;;  %v5049_v24 = vld [vmem:[%s5949_s11 + $0x28] sm:$0xff]  }
 0x43e   : > { %v2263_v27 = vpop.f32.mrb[38].mxu1 }
 0x43f   : > { %v4710_v28 = vpop.f32.mrb[39].mxu1  ;;  %4732 = vmatmul.mubr.msk.bf16.vlgmr.msra.gmra.mrb[44].mxu1 %vm1844_vm2, %v2269_v25  ;;  %v5050_v25 = vld [vmem:[%s5949_s11 + $0x38] sm:$0xff]   ;;  %v5051_v26 = vld [vmem:[%s5951_s3] sm:$0xff]   ;;  %v5052_v27 = vld [vmem:[%s5951_s3 + $0x10] sm:$0xff]  }
 0x440   : > { %4747 = vmatprep.mubr.msk.bf16.mxu1 %vm5215_vm0, %v5214_v1  ;;  %4744 = vmatpush3.bf16.msra.mxu1 %v5036_v62  ;;  %v5053_v28 = vld [vmem:[%s5951_s3 + $0x8] sm:$0xff]  }
 0x441   : > { %4745 = vmatprep.subr.bf16.mxu1 %v5214_v1  ;;  %4738 = vmatpush3.bf16.msra.mxu0 %v5037_v63 }
 0x442   : > { %4751 = vmatprep.subr.bf16.mxu0 %v5214_v1 }
 0x444   : > { %4746 = vmatpush3.bf16.msra.mxu1 %v5038_v0 }
 0x445   : > { %4759 = vmatprep.subr.bf16.mxu1 %v5214_v1 }
 0x506   : > { %v2310_v29 = vpop.f32.mrb[40].mxu0 }
 0x507   : > { %v4715_v30 = vpop.f32.mrb[41].mxu0  ;;  %v2454_v34 = vsel %vm1164_vm1, %v2310_v29, 0.0  ;;  %v5054_v29 = vld [vmem:[%s5951_s3 + $0x18] sm:$0xff]  }
 0x508   : > { %v2313_v31 = vpop.f32.mrb[42].mxu0  ;;  %v5055_v30 = vld [vmem:[%s5951_s3 + $0x20] sm:$0xff]  }
 0x509   : > { %v4716_v32 = vpop.f32.mrb[43].mxu0  ;;  %v5056_v31 = vld [vmem:[%s5951_s3 + $0x30] sm:$0xff]  }
 0x50a   : > { %v2356_v33 = vpop.f32.mrb[40].mxu1  ;;  %v5057_v32 = vld [vmem:[%s5951_s3 + $0x28] sm:$0xff]  }
 0x50b   : > { %v2455_v35 = vsel %vm1164_vm1, %v2356_v33, 0.0  ;;  %v4721_v36 = vpop.f32.mrb[41].mxu1  ;;  %v5058_v33 = vld [vmem:[%s5951_s3 + $0x38] sm:$0xff]   ;;  %s5954_s3 = sld [smem:[#allocation17_spill]] }
 0x50c   : > { %v2456_v37 = vadd.f32 %v2455_v35, %v2454_v34  ;;  %v2359_v38 = vpop.f32.mrb[42].mxu1 }
 0x50d   : > { %v4722_v39 = vpop.f32.mrb[43].mxu1 }
 0x50e   : > { %v2402_v40 = vpop.f32.mrb[44].mxu0 }
 0x50f   : > { %v2457_v41 = vsel %vm1164_vm1, %v2402_v40, 0.0  ;;  %v4727_v42 = vpop.f32.mrb[45].mxu0 }
 0x510   : > { %v2458_v43 = vadd.f32 %v2457_v41, %v2456_v37  ;;  %v2405_v44 = vpop.f32.mrb[46].mxu0 }
 0x511   : > { %v4728_v45 = vpop.f32.mrb[47].mxu0 }
 0x512   : > { %v2448_v46 = vpop.f32.mrb[44].mxu1 }
 0x513   : > { %v2459_v50 = vsel %vm1164_vm1, %v2448_v46, 0.0  ;;  %v4733_v51 = vpop.f32.mrb[45].mxu1 }
 0x514   : > { %v2460_v52 = vadd.f32 %v2459_v50, %v2458_v43  ;;  %v2451_v53 = vpop.f32.mrb[46].mxu1 }
 0x515   : > { %v4734_v54 = vpop.f32.mrb[47].mxu1  ;;  %v4376_v53 = vld [vmem:[%s5952_s7 + $0x1] ss:$0 sm:$0xff] }
 0x516   : > { %v2467_v55 = vadd.f32 %v4356_v49, %v2460_v52  ;;  %v4375_v52 = vld [vmem:[%s5952_s7] ss:$0 sm:$0xff] }
 0x517   : > { %v4359_v54 = vld [vmem:[%s5953_s16] ss:$0 sm:$0xff] }
 0x518   : > { %v2468_v56 = vadd.f32 %v2467_v55, %v5460_v6  ;;  %v4360_v55 = vld [vmem:[%s5953_s16 + $0x1] ss:$0 sm:$0xff] }
 0x51a   : > { %v2471_v47 = vsel %vm1164_vm1, %v2468_v56, 0.0 }
 0x51b   : > { %2472 = vadd.xlane.f32.xlu0 %v2471_v47 }
 0x5a8   : > { %v2473_v57 = vpop.xlane.xlu0 %2472 }
 0x5a9   : > { %v2475_v48 = vmul.f32 0.03125, %v2473_v57 }
 0x5ab   : > { %v2476_v58 = vsub.f32 %v2468_v56, %v2475_v48 }
 0x5ad   : > { %v2477_v59 = vmul.f32 %v2476_v58, %v2476_v58 }
 0x5af   : > { %v2478_v60 = vsel %vm1164_vm1, %v2477_v59, 0.0 }
 0x5b0   : > { %2479 = vadd.xlane.f32.xlu1 %v2478_v60 }
 0x63d   : > { %v2480_v6 = vpop.xlane.xlu1 %2479 }
 0x63e   : > { %v2481_v2 = vmul.f32 0.03125, %v2480_v6 }
 0x640   : > { %v2482_v3 = vadd.f32 1e-12, %v2481_v2 }
 0x642   : > { %5081 = vrsqrt.f32 %v2482_v3 }
 0x64c   : > { %v5082_v4 = vpop.eup %5081 }
 0x64d   : > { %v2484_v7 = vmul.f32 %v5082_v4, %v2476_v58 }
 0x64f   : > { %v2491_v9 = vmul.f32 %v4357_v5, %v2484_v7  ;;  %v4377_v7 = vld [vmem:[%s5952_s7 + $0x2] ss:$0 sm:$0xff] }
 0x651   : > { %v5652_v10 = vadd.f32 %v4358_v8, %v2491_v9 }
 0x653   : > { %v2564_v13 = vpack.c.bf16 %v5652_v10, %v5652_v10 }
 0x655   : > { %4740 = vmatmul.mubr.msk.bf16.vlgmr.msra.gmra.mrb[48].mxu0 %vm1164_vm1, %v2564_v13  ;;  %4748 = vmatmul.mubr.msk.bf16.vlgmr.msra.gmra.mrb[48].mxu1 %vm1164_vm1, %v2564_v13 }
 0x656   : > { %4752 = vmatpush3.bf16.msra.mxu0 %v5039_v11  ;;  %4760 = vmatpush3.bf16.msra.mxu1 %v5040_v12  ;;  %v4378_v11 = vld [vmem:[%s5952_s7 + $0x3] ss:$0 sm:$0xff]  ;;  %v4361_v12 = vld [vmem:[%s5953_s16 + $0x2] ss:$0 sm:$0xff]  ;;  %s5962_s7 = sld [smem:[#allocation23_spill]] }
 0x657   : > { %4753 = vmatprep.subr.bf16.mxu0 %v5214_v1  ;;  %4761 = vmatprep.subr.bf16.mxu1 %v5214_v1 }
 0x658   : > { %4755 = vmatprep.mubr.msk.bf16.mxu0 %vm5215_vm0, %v5214_v1  ;;  %4763 = vmatprep.mubr.msk.bf16.mxu1 %vm5215_vm0, %v5214_v1 }
 0x65a   : > { %4754 = vmatpush3.bf16.msra.mxu0 %v5041_v14  ;;  %4762 = vmatpush3.bf16.msra.mxu1 %v5042_v15 }
 0x65b   : > { %4767 = vmatprep.subr.bf16.mxu0 %v5214_v1  ;;  %4775 = vmatprep.subr.bf16.mxu1 %v5214_v1 }
 0x65d   : > { %4756 = vmatmul.mubr.msk.bf16.vlgmr.msra.gmra.mrb[52].mxu0 %vm1164_vm1, %v2564_v13  ;;  %4764 = vmatmul.mubr.msk.bf16.vlgmr.msra.gmra.mrb[52].mxu1 %vm1164_vm1, %v2564_v13  ;;  %v4362_v13 = vld [vmem:[%s5953_s16 + $0x3] ss:$0 sm:$0xff] }
 0x65e   : > { %4768 = vmatpush3.bf16.msra.mxu0 %v5043_v16  ;;  %4776 = vmatpush3.bf16.msra.mxu1 %v5044_v17 }
 0x65f   : > { %4769 = vmatprep.subr.bf16.mxu0 %v5214_v1  ;;  %4777 = vmatprep.subr.bf16.mxu1 %v5214_v1 }
 0x660   : > { %4771 = vmatprep.mubr.msk.bf16.mxu0 %vm5215_vm0, %v5214_v1  ;;  %4779 = vmatprep.mubr.msk.bf16.mxu1 %vm5215_vm0, %v5214_v1 }
 0x662   : > { %4770 = vmatpush3.bf16.msra.mxu0 %v5045_v19  ;;  %4778 = vmatpush3.bf16.msra.mxu1 %v5046_v20 }
 0x663   : > { %4783 = vmatprep.subr.bf16.mxu0 %v5214_v1  ;;  %4791 = vmatprep.subr.bf16.mxu1 %v5214_v1 }
 0x665   : > { %4772 = vmatmul.mubr.msk.bf16.vlgmr.msra.gmra.mrb[56].mxu0 %vm1164_vm1, %v2565_v21  ;;  %4780 = vmatmul.mubr.msk.bf16.vlgmr.msra.gmra.mrb[56].mxu1 %vm1164_vm1, %v2565_v21 }
 0x666   : > { %4784 = vmatpush3.bf16.msra.mxu0 %v5047_v22  ;;  %4792 = vmatpush3.bf16.msra.mxu1 %v5048_v23 }
 0x667   : > { %4785 = vmatprep.subr.bf16.mxu0 %v5214_v1  ;;  %4793 = vmatprep.subr.bf16.mxu1 %v5214_v1 }
 0x668   : > { %4787 = vmatprep.mubr.msk.bf16.mxu0 %vm5215_vm0, %v5214_v1  ;;  %4795 = vmatprep.mubr.msk.bf16.mxu1 %vm5215_vm0, %v5214_v1 }
 0x66a   : > { %4786 = vmatpush3.bf16.msra.mxu0 %v5049_v24  ;;  %4794 = vmatpush3.bf16.msra.mxu1 %v5050_v25 }
 0x66b   : > { %4799 = vmatprep.subr.bf16.mxu0 %v5214_v1  ;;  %4807 = vmatprep.subr.bf16.mxu1 %v5214_v1 }
 0x66d   : > { %4788 = vmatmul.mubr.msk.bf16.vlgmr.msra.gmra.mrb[60].mxu0 %vm1164_vm1, %v2565_v21  ;;  %4796 = vmatmul.mubr.msk.bf16.vlgmr.msra.gmra.mrb[60].mxu1 %vm1164_vm1, %v2565_v21 }
 0x66e   : > { %4800 = vmatpush3.bf16.msra.mxu0 %v5051_v26  ;;  %4803 = vmatprep.mubr.msk.bf16.mxu0 %vm5215_vm0, %v5214_v1 }
 0x66f   : > { %4801 = vmatprep.subr.bf16.mxu0 %v5214_v1  ;;  %4811 = vmatprep.mubr.msk.bf16.mxu1 %vm5215_vm0, %v5214_v1 }
 0x670   : > { %4808 = vmatpush3.bf16.msra.mxu1 %v5052_v27 }
 0x671   : > { %4809 = vmatprep.subr.bf16.mxu1 %v5214_v1 }
 0x672   : > { %4802 = vmatpush3.bf16.msra.mxu0 %v5053_v28 }
 0x673   : > { %4815 = vmatprep.subr.bf16.mxu0 %v5214_v1 }
 0x674   : > { %4810 = vmatpush3.bf16.msra.mxu1 %v5054_v29 }
 0x675   : > { %4804 = vmatmul.mubr.msk.bf16.vlgmr.msra.gmra.mrb[64].mxu0 %vm1164_vm1, %v2565_v21  ;;  %4823 = vmatprep.subr.bf16.mxu1 %v5214_v1 }
 0x676   : > { %4819 = vmatprep.mubr.msk.bf16.mxu0 %vm5215_vm0, %v5214_v1  ;;  %4816 = vmatpush3.bf16.msra.mxu0 %v5055_v30 }
 0x677   : > { %4812 = vmatmul.mubr.msk.bf16.vlgmr.msra.gmra.mrb[64].mxu1 %vm1164_vm1, %v2565_v21  ;;  %4817 = vmatprep.subr.bf16.mxu0 %v5214_v1 }
 0x678   : > { %4824 = vmatpush3.bf16.msra.mxu1 %v5056_v31  ;;  %4827 = vmatprep.mubr.msk.bf16.mxu1 %vm5215_vm0, %v5214_v1 }
 0x679   : > { %4825 = vmatprep.subr.bf16.mxu1 %v5214_v1 }
 0x67a   : > { %4818 = vmatpush3.bf16.msra.mxu0 %v5057_v32 }
 0x67b   : > { %4831 = vmatprep.subr.bf16.mxu0 %v5214_v1 }
 0x67c   : > { %4826 = vmatpush3.bf16.msra.mxu1 %v5058_v33 }
 0x67d   : > { %4837 = vmatprep.subr.bf16.mxu1 %v5214_v1  ;;  %4820 = vmatmul.mubr.msk.bf16.vlgmr.msra.gmra.mrb[68].mxu0 %vm1164_vm1, %v2565_v21 }
 0x67e   : > { %4833 = vmatprep.mubr.msk.bf16.mxu0 %vm5215_vm0, %v5214_v1 }
 0x67f   : > { %4828 = vmatmul.mubr.msk.bf16.vlgmr.msra.gmra.mrb[68].mxu1 %vm1164_vm1, %v2565_v21 }
 0x680   : > { %4839 = vmatprep.mubr.msk.bf16.mxu1 %vm5215_vm0, %v5214_v1 }
 0x728   : > { %v2639_v34 = vpop.f32.mrb[48].mxu0  ;;  %v2691_v35 = vpop.f32.mrb[48].mxu1 }
 0x729   : > { %v4741_v36 = vpop.f32.mrb[49].mxu0  ;;  %v4749_v37 = vpop.f32.mrb[49].mxu1  ;;  %v2640_v60 = vadd.f32 %v4359_v54, %v2639_v34  ;;  %v2692_v61 = vadd.f32 %v4360_v55, %v2691_v35 }
 0x72a   : > { %v2642_v38 = vpop.f32.mrb[50].mxu0  ;;  %v2694_v39 = vpop.f32.mrb[50].mxu1  ;;  %v4391_v36 = vld [vmem:[%s5954_s3] ss:$0 sm:$0xff] }
 0x72b   : > { %v4742_v40 = vpop.f32.mrb[51].mxu0  ;;  %v4750_v41 = vpop.f32.mrb[51].mxu1  ;;  %v3268_v8 = vmul.f32 0.35355338, %v2640_v60  ;;  %v3269_v9 = vmul.f32 0.35355338, %v2692_v61 }
 0x72c   : > { %v4392_v38 = vld [vmem:[%s5954_s3 + $0x1] ss:$0 sm:$0xff]  ;;  %v4407_v60 = vld [vmem:[%s1054_s6] ss:$0 sm:$0xff]  ;;  %s5957_s6 = sld [smem:[#allocation19_spill]] }
 0x72d   : > { %v3272_v20 = vpack.c.bf16 %v3268_v8, %v3268_v8  ;;  %v3273_v21 = vpack.c.bf16 %v3269_v9, %v3269_v9 }
 0x730   : > { %v2743_v42 = vpop.f32.mrb[52].mxu0  ;;  %v2795_v43 = vpop.f32.mrb[52].mxu1 }
 0x731   : > { %v4757_v44 = vpop.f32.mrb[53].mxu0  ;;  %v4765_v45 = vpop.f32.mrb[53].mxu1  ;;  %v2744_v24 = vadd.f32 %v4361_v12, %v2743_v42  ;;  %v2796_v25 = vadd.f32 %v4362_v13, %v2795_v43 }
 0x732   : > { %v2746_v46 = vpop.f32.mrb[54].mxu0  ;;  %v2798_v49 = vpop.f32.mrb[54].mxu1 }
 0x733   : > { %v4758_v50 = vpop.f32.mrb[55].mxu0  ;;  %v4766_v51 = vpop.f32.mrb[55].mxu1  ;;  %v3270_v32 = vmul.f32 0.35355338, %v2744_v24  ;;  %v3271_v33 = vmul.f32 0.35355338, %v2796_v25 }
 0x735   : > { %v3274_v34 = vpack.c.bf16 %v3270_v32, %v3270_v32  ;;  %v3275_v35 = vpack.c.bf16 %v3271_v33, %v3271_v33 }
 0x738   : > { %v2874_v56 = vpop.f32.mrb[56].mxu0  ;;  %v2926_v47 = vpop.f32.mrb[56].mxu1 }
 0x739   : > { %v2875_v57 = vadd.f32 %v4375_v52, %v2874_v56  ;;  %v2927_v48 = vadd.f32 %v4376_v53, %v2926_v47  ;;  %v4773_v58 = vpop.f32.mrb[57].mxu0  ;;  %v4781_v59 = vpop.f32.mrb[57].mxu1 }
 0x73a   : > { %v2877_v62 = vpop.f32.mrb[58].mxu0  ;;  %v2929_v63 = vpop.f32.mrb[58].mxu1 }
 0x73b   : > { %v3276_v0 = vpack.c.bf16 %v2875_v57, %v2875_v57  ;;  %v3277_v6 = vpack.c.bf16 %v2927_v48, %v2927_v48  ;;  %v4774_v2 = vpop.f32.mrb[59].mxu0  ;;  %v4782_v3 = vpop.f32.mrb[59].mxu1 }
 0x73d   : > { %v3290_v4 = vsel %vm1844_vm2, %v3276_v0, 0  ;;  %v3336_v5 = vsel %vm1844_vm2, %v3277_v6, 0 }
 0x73e   : > { %4832 = vmatpush3.bf16.xpose.msra.mxu0 %v3290_v4  ;;  %4838 = vmatpush3.bf16.xpose.msra.mxu1 %v3336_v5 }
 0x73f   : > { %4843 = vmatprep.subr.bf16.mxu0 %v5214_v1  ;;  %4849 = vmatprep.subr.bf16.mxu1 %v5214_v1 }
 0x740   : > { %v2978_v14 = vpop.f32.mrb[60].mxu0  ;;  %v3030_v15 = vpop.f32.mrb[60].mxu1 }
 0x741   : > { %v2979_v16 = vadd.f32 %v4377_v7, %v2978_v14  ;;  %v3031_v17 = vadd.f32 %v4378_v11, %v3030_v15  ;;  %v4789_v18 = vpop.f32.mrb[61].mxu0  ;;  %v4797_v19 = vpop.f32.mrb[61].mxu1 }
 0x742   : > { %v2981_v22 = vpop.f32.mrb[62].mxu0  ;;  %v3033_v23 = vpop.f32.mrb[62].mxu1 }
 0x743   : > { %v3278_v26 = vpack.c.bf16 %v2979_v16, %v2979_v16  ;;  %v3279_v27 = vpack.c.bf16 %v3031_v17, %v3031_v17  ;;  %v4790_v28 = vpop.f32.mrb[63].mxu0  ;;  %v4798_v29 = vpop.f32.mrb[63].mxu1 }
 0x745   : > { %v3382_v30 = vsel %vm1844_vm2, %v3278_v26, 0  ;;  %v3428_v31 = vsel %vm1844_vm2, %v3279_v27, 0  ;;  %4834 = vmatmul.mubr.msk.bf16.vlgmr.msra.gmra.mrb[72].mxu0 %vm1844_vm2, %v3272_v20  ;;  %4840 = vmatmul.mubr.msk.bf16.vlgmr.msra.gmra.mrb[72].mxu1 %vm1844_vm2, %v3273_v21 }
 0x746   : > { %4844 = vmatpush3.bf16.xpose.msra.mxu0 %v3382_v30  ;;  %4850 = vmatpush3.bf16.xpose.msra.mxu1 %v3428_v31 }
 0x747   : > { %4845 = vmatprep.mubr.msk.bf16.mxu0 %vm5215_vm0, %v5214_v1  ;;  %4851 = vmatprep.mubr.msk.bf16.mxu1 %vm5215_vm0, %v5214_v1 }
 0x748   : > { %4855 = vmatprep.subr.bf16.mxu0 %v5214_v1  ;;  %4861 = vmatprep.subr.bf16.mxu1 %v5214_v1  ;;  %v3106_v37 = vpop.f32.mrb[64].mxu0 }
 0x749   : > { %v3107_v39 = vadd.f32 %v4391_v36, %v3106_v37  ;;  %v4805_v40 = vpop.f32.mrb[65].mxu0 }
 0x74a   : > { %v3109_v41 = vpop.f32.mrb[66].mxu0  ;;  %v3158_v42 = vpop.f32.mrb[64].mxu1 }
 0x74b   : > { %v3518_v43 = vpack.c.bf16 %v3107_v39, %v3107_v39  ;;  %v3159_v44 = vadd.f32 %v4392_v38, %v3158_v42  ;;  %v4806_v45 = vpop.f32.mrb[67].mxu0  ;;  %v4813_v46 = vpop.f32.mrb[65].mxu1 }
 0x74c   : > { %v3161_v49 = vpop.f32.mrb[66].mxu1  ;;  %v4394_v45 = vld [vmem:[%s5954_s3 + $0x3] ss:$0 sm:$0xff]  ;;  %v4393_v46 = vld [vmem:[%s5954_s3 + $0x2] ss:$0 sm:$0xff]  ;;  %s5959_s3 = sld [smem:[#allocation24_spill]] }
 0x74d   : > { %4846 = vmatmul.mubr.msk.bf16.vlgmr.msra.gmra.mrb[76].mxu0 %vm1844_vm2, %v3274_v34  ;;  %4852 = vmatmul.mubr.msk.bf16.vlgmr.msra.gmra.mrb[76].mxu1 %vm1844_vm2, %v3275_v35  ;;  %v3526_v50 = vsel %vm2084_vm3, %v3518_v43, 0  ;;  %v3519_v51 = vpack.c.bf16 %v3159_v44, %v3159_v44  ;;  %v4814_v52 = vpop.f32.mrb[67].mxu1 }
 0x74e   : > { %4857 = vmatprep.mubr.msk.bf16.mxu0 %vm5215_vm0, %v5214_v1  ;;  %4863 = vmatprep.mubr.msk.bf16.mxu1 %vm5215_vm0, %v5214_v1 }
 0x74f   : > { %4856 = vmatpush3.bf16.msra.mxu0 %v3526_v50  ;;  %v3572_v53 = vsel %vm2084_vm3, %v3519_v51, 0 }
 0x750   : > { %4867 = vmatprep.subr.bf16.mxu0 %v5214_v1  ;;  %4862 = vmatpush3.bf16.msra.mxu1 %v3572_v53  ;;  %v5768_v54 = vpop.f32.mrb[68].mxu0 }
 0x751   : > { %4873 = vmatprep.subr.bf16.mxu1 %v5214_v1  ;;  %v4821_v56 = vpop.f32.mrb[69].mxu0  ;;  %v3211_v51 = vadd.f32 %v4393_v46, %v5768_v54 }
 0x752   : > { %v5770_v55 = vpop.f32.mrb[68].mxu1  ;;  %v3213_v57 = vpop.f32.mrb[70].mxu0 }
 0x753   : > { %v4829_v47 = vpop.f32.mrb[69].mxu1  ;;  %v4822_v58 = vpop.f32.mrb[71].mxu0  ;;  %v3263_v49 = vadd.f32 %v4394_v45, %v5770_v55 }
 0x754   : > { %v3265_v48 = vpop.f32.mrb[70].mxu1 }
 0x755   : > { %v4830_v59 = vpop.f32.mrb[71].mxu1  ;;  %v3521_v47 = vpack.c.bf16 %v3263_v49, %v3263_v49  ;;  %v3520_v48 = vpack.c.bf16 %v3211_v51, %v3211_v51 }
 0x757   : > { %v3618_v55 = vsel %vm2084_vm3, %v3520_v48, 0 }
 0x818   : > { %v3326_v61 = vpop.f32.mrb[72].mxu0  ;;  %v3372_v62 = vpop.f32.mrb[72].mxu1 }
 0x819   : > { %v3327_v63 = vadd.f32 %v4407_v60, %v3326_v61  ;;  %v3373_v0 = vadd.f32 %v4407_v60, %v3372_v62  ;;  %v4835_v6 = vpop.f32.mrb[73].mxu0  ;;  %v4841_v2 = vpop.f32.mrb[73].mxu1  ;;  %v3664_v61 = vsel %vm2084_vm3, %v3521_v47, 0  ;;  %v2560_v62 = vld [vmem:[%s5956_s5 + $0x4] sm:$0xf] }
 0x81a   : > { %v3329_v3 = vpop.f32.mrb[74].mxu0  ;;  %v3375_v4 = vpop.f32.mrb[74].mxu1  ;;  %v2559_v6 = vld [vmem:[%s5956_s5] sm:$0xf] }
 0x81b   : > { %v4836_v5 = vpop.f32.mrb[75].mxu0  ;;  %v4842_v7 = vpop.f32.mrb[75].mxu1  ;;  %v3473_v8 = vsel %vm1844_vm2, %v3373_v0, -inf  ;;  %v3470_v9 = vsel %vm1844_vm2, %v3327_v63, -inf  ;;  %v3760_v4 = vsel %vm2084_vm3, %v2560_v62, 0 }
 0x81c   : > { %3474 = vmax.xlane.f32.xlu1 %v3473_v8  ;;  %3471 = vmax.xlane.f32.xlu0 %v3470_v9  ;;  %v3714_v7 = vsel %vm2084_vm3, %v2559_v6, 0  ;;  %v2562_v8 = vld [vmem:[%s5956_s5 + $0xc] sm:$0xf]  ;;  %v2561_v9 = vld [vmem:[%s5956_s5 + $0x8] sm:$0xf]  ;;  %v5059_v6 = vld [vmem:[%s5958_s0] sm:$0xff]  }
 0x81d   : > { %v4420_v47 = vld [vmem:[%s5957_s6] ss:$0 sm:$0xff]  ;;  %s5960_s6 = sld [smem:[#allocation20_spill]]  ;;  %s5961_s5 = sld [smem:[#allocation21_spill]] }
 0x820   : > { %v3418_v11 = vpop.f32.mrb[76].mxu0  ;;  %v3464_v12 = vpop.f32.mrb[76].mxu1 }
 0x821   : > { %v3419_v13 = vadd.f32 %v4407_v60, %v3418_v11  ;;  %v3465_v14 = vadd.f32 %v4407_v60, %v3464_v12  ;;  %v4847_v15 = vpop.f32.mrb[77].mxu0  ;;  %v4853_v16 = vpop.f32.mrb[77].mxu1 }
 0x822   : > { %v3421_v17 = vpop.f32.mrb[78].mxu0  ;;  %v3467_v18 = vpop.f32.mrb[78].mxu1  ;;  %v3852_v15 = vsel %vm2084_vm3, %v2562_v8, 0 }
 0x823   : > { %v4848_v19 = vpop.f32.mrb[79].mxu0  ;;  %v4854_v20 = vpop.f32.mrb[79].mxu1  ;;  %v3479_v21 = vsel %vm1844_vm2, %v3465_v14, -inf  ;;  %v3476_v22 = vsel %vm1844_vm2, %v3419_v13, -inf }
 0x824   : > { %3480 = vmax.xlane.f32.xlu1 %v3479_v21  ;;  %3477 = vmax.xlane.f32.xlu0 %v3476_v22  ;;  %v3806_v19 = vsel %vm2084_vm3, %v2561_v9, 0  ;;  %v4421_v9 = vld [vmem:[%s5960_s6] ss:$0 sm:$0xff] }
 0x8a9   : > { %v3475_v23 = vpop.xlane.xlu1 %3474  ;;  %v3472_v24 = vpop.xlane.xlu0 %3471 }
 0x8aa   : > { %v3483_v25 = vsub.f32 %v3373_v0, %v3475_v23  ;;  %v3482_v26 = vsub.f32 %v3327_v63, %v3472_v24 }
 0x8ac   : > { %v3488_v27 = vmul.f32 1.442695, %v3483_v25  ;;  %v3486_v28 = vmul.f32 1.442695, %v3482_v26 }
 0x8ae   : > { %5083 = vpow2.f32 %v3488_v27 }
 0x8af   : > { %5085 = vpow2.f32 %v3486_v28 }
 0x8b1   : > { %v3481_v29 = vpop.xlane.xlu1 %3480  ;;  %v3478_v30 = vpop.xlane.xlu0 %3477 }
 0x8b2   : > { %v3485_v31 = vsub.f32 %v3465_v14, %v3481_v29  ;;  %v3484_v32 = vsub.f32 %v3419_v13, %v3478_v30 }
 0x8b4   : > { %v3492_v33 = vmul.f32 1.442695, %v3485_v31  ;;  %v3490_v34 = vmul.f32 1.442695, %v3484_v32 }
 0x8b6   : > { %5087 = vpow2.f32 %v3492_v33 }
 0x8b7   : > { %5089 = vpow2.f32 %v3490_v34 }
 0x8b8   : > { %v5084_v35 = vpop.eup %5083 }
 0x8b9   : > { %v5086_v36 = vpop.eup %5085  ;;  %v3497_v37 = vsel %vm1844_vm2, %v5084_v35, 0.0 }
 0x8ba   : > { %3498 = vadd.xlane.f32.xlu1 %v3497_v37  ;;  %v3494_v38 = vsel %vm1844_vm2, %v5086_v36, 0.0 }
 0x8bb   : > { %3495 = vadd.xlane.f32.xlu0 %v3494_v38 }
 0x8c0   : > { %v5088_v39 = vpop.eup %5087 }
 0x8c1   : > { %v5090_v40 = vpop.eup %5089  ;;  %v3503_v41 = vsel %vm1844_vm2, %v5088_v39, 0.0 }
 0x8c2   : > { %3504 = vadd.xlane.f32.xlu1 %v3503_v41  ;;  %v3500_v42 = vsel %vm1844_vm2, %v5090_v40, 0.0 }
 0x8c3   : > { %3501 = vadd.xlane.f32.xlu0 %v3500_v42 }
 0x947   : > { %v3499_v43 = vpop.xlane.xlu1 %3498 }
 0x948   : > { %5091 = vrcp.f32 %v3499_v43  ;;  %v3496_v44 = vpop.xlane.xlu0 %3495 }
 0x949   : > { %5093 = vrcp.f32 %v3496_v44 }
 0x94f   : > { %v3505_v50 = vpop.xlane.xlu1 %3504 }
 0x950   : > { %5095 = vrcp.f32 %v3505_v50  ;;  %v3502_v52 = vpop.xlane.xlu0 %3501 }
 0x951   : > { %5097 = vrcp.f32 %v3502_v52 }
 0x952   : > { %v5092_v53 = vpop.eup %5091 }
 0x953   : > { %v5094_v56 = vpop.eup %5093  ;;  %v3511_v57 = vmul.f32 %v5092_v53, %v5084_v35 }
 0x954   : > { %v3510_v58 = vmul.f32 %v5094_v56, %v5086_v36 }
 0x955   : > { %v3515_v59 = vpack.c.bf16 %v3511_v57, %v3511_v57 }
 0x956   : > { %v3514_v60 = vpack.c.bf16 %v3510_v58, %v3510_v58 }
 0x957   : > { %4864 = vmatmul.mubr.msk.bf16.vlgmr.msra.gmra.mrb[80].mxu1 %vm1844_vm2, %v3515_v59 }
 0x958   : > { %4858 = vmatmul.mubr.msk.bf16.vlgmr.msra.gmra.mrb[80].mxu0 %vm1844_vm2, %v3514_v60  ;;  %4874 = vmatpush3.bf16.msra.mxu1 %v3664_v61 }
 0x959   : > { %4868 = vmatpush3.bf16.msra.mxu0 %v3618_v55  ;;  %4869 = vmatprep.mubr.msk.bf16.mxu0 %vm5215_vm0, %v5214_v1 }
 0x95a   : > { %v5096_v54 = vpop.eup %5095  ;;  %4875 = vmatprep.mubr.msk.bf16.mxu1 %vm5215_vm0, %v5214_v1  ;;  %4879 = vmatprep.subr.bf16.mxu0 %v5214_v1 }
 0x95b   : > { %v5098_v63 = vpop.eup %5097  ;;  %v3513_v0 = vmul.f32 %v5096_v54, %v5088_v39  ;;  %4885 = vmatprep.subr.bf16.mxu1 %v5214_v1 }
 0x95c   : > { %v3512_v2 = vmul.f32 %v5098_v63, %v5090_v40 }
 0x95d   : > { %v3517_v3 = vpack.c.bf16 %v3513_v0, %v3513_v0 }
 0x95e   : > { %v3516_v5 = vpack.c.bf16 %v3512_v2, %v3512_v2  ;;  %v5060_v2 = vld [vmem:[%s5958_s0 + $0x8] sm:$0xff]   ;;  %s4436_s0 = sshll.u32 %s5173_s28, 7  ;;  %s5216_s28 = smov [#allocation2]  }
 0x95f   : > { %4876 = vmatmul.mubr.msk.bf16.vlgmr.msra.gmra.mrb[84].mxu1 %vm1844_vm2, %v3517_v3  ;;  %v5062_v3 = vld [vmem:[%s5959_s3 + $0x8] sm:$0xff]  }
 0x960   : > { %4870 = vmatmul.mubr.msk.bf16.vlgmr.msra.gmra.mrb[84].mxu0 %vm1844_vm2, %v3516_v5  ;;  %4886 = vmatpush3.bf16.msra.mxu1 %v3760_v4 }
 0x961   : > { %4880 = vmatpush3.bf16.msra.mxu0 %v3714_v7  ;;  %4881 = vmatprep.mubr.msk.bf16.mxu0 %vm5215_vm0, %v5214_v1 }
 0x962   : > { %4887 = vmatprep.mubr.msk.bf16.mxu1 %vm5215_vm0, %v5214_v1  ;;  %4891 = vmatprep.subr.bf16.mxu0 %v5214_v1 }
 0x963   : > { %4897 = vmatprep.subr.bf16.mxu1 %v5214_v1 }
 0xa2a   : > { %v3608_v11 = vpop.f32.mrb[80].mxu1 }
 0xa2b   : > { %v3562_v12 = vpop.f32.mrb[80].mxu0  ;;  %v3707_v13 = vpack.c.bf16 %v3608_v11, %v3608_v11  ;;  %v4865_v14 = vpop.f32.mrb[81].mxu1 }
 0xa2c   : > { %v3706_v16 = vpack.c.bf16 %v3562_v12, %v3562_v12  ;;  %v4859_v17 = vpop.f32.mrb[81].mxu0  ;;  %v3611_v18 = vpop.f32.mrb[82].mxu1  ;;  %v4422_v12 = vld [vmem:[%s5961_s5] ss:$0 sm:$0xff]  ;;  %s1027_s5 = sand.u32 1, %s5165_s23  }
 0xa2d   : > { %v3565_v20 = vpop.f32.mrb[82].mxu0  ;;  %v4866_v21 = vpop.f32.mrb[83].mxu1  ;;  %4888 = vmatmul.mubr.msk.bf16.vlgmr.msra.gmra.mrb[88].mxu1 %vm1844_vm2, %v3707_v13  ;;  %v5064_v17 = vld [vmem:[%s5959_s3 + $0x18] sm:$0xff]   ;;  %v4423_v18 = vld [vmem:[%s5962_s7] ss:$0 sm:$0xff]  ;;  %s5964_s7 = sld [smem:[#allocation26_spill]] }
 0xa2e   : > { %v4860_v22 = vpop.f32.mrb[83].mxu0  ;;  %4882 = vmatmul.mubr.msk.bf16.vlgmr.msra.gmra.mrb[88].mxu0 %vm1844_vm2, %v3706_v16  ;;  %4898 = vmatpush3.bf16.msra.mxu1 %v3852_v15  ;;  %v5063_v16 = vld [vmem:[%s5959_s3 + $0x10] sm:$0xff]   ;;  %s4291_s6 = sshll.u32 %s1027_s5, 3  ;;  %s4122_s11 = scalar_lea.sflag [#allocation3], %s1027_s5 }
 0xa2f   : > { %4892 = vmatpush3.bf16.msra.mxu0 %v3806_v19  ;;  %4893 = vmatprep.mubr.msk.bf16.mxu0 %vm5215_vm0, %v5214_v1 }
 0xa30   : > { %4899 = vmatprep.mubr.msk.bf16.mxu1 %vm5215_vm0, %v5214_v1  ;;  %4903 = vmatprep.subr.bf16.mxu0 %v5214_v1 }
 0xa31   : > { %4911 = vmatprep.subr.bf16.mxu1 %v5214_v1 }
 0xa32   : > { %v3700_v23 = vpop.f32.mrb[84].mxu1 }
 0xa33   : > { %v3654_v24 = vpop.f32.mrb[84].mxu0  ;;  %v3709_v25 = vpack.c.bf16 %v3700_v23, %v3700_v23  ;;  %v4877_v26 = vpop.f32.mrb[85].mxu1  ;;  %s5856_s9 = scalar_lea.hbm %s5964_s7, %s4436_s0 }
 0xa34   : > { %v3708_v27 = vpack.c.bf16 %v3654_v24, %v3654_v24  ;;  %v4871_v28 = vpop.f32.mrb[85].mxu0  ;;  %v3703_v29 = vpop.f32.mrb[86].mxu1  ;;  %v4427_v26 = vld [vmem:[%s5365_s27] ss:$0 sm:$0xff] }
 0xa35   : > { %v3657_v30 = vpop.f32.mrb[86].mxu0  ;;  %v4878_v31 = vpop.f32.mrb[87].mxu1  ;;  %4900 = vmatmul.mubr.msk.bf16.vlgmr.msra.gmra.mrb[92].mxu1 %vm1844_vm2, %v3709_v25 }
 0xa36   : > { %v4872_v32 = vpop.f32.mrb[87].mxu0  ;;  %4894 = vmatmul.mubr.msk.bf16.vlgmr.msra.gmra.mrb[92].mxu0 %vm1844_vm2, %v3708_v27  ;;  %4919 = vmatprep.mubr.msk.bf16.mxu1 %vm5215_vm0, %v5214_v1 }
 0xa37   : > { %4907 = vmatprep.mubr.msk.bf16.mxu0 %vm5215_vm0, %v5214_v1  ;;  %4904 = vmatpush3.bf16.msra.mxu0 %v5059_v6 }
 0xa38   : > { %4905 = vmatprep.subr.bf16.mxu0 %v5214_v1 }
 0xa3b   : > { %4906 = vmatpush3.bf16.msra.mxu0 %v5060_v2 }
 0xb00   : > { %v3796_v33 = vpop.f32.mrb[88].mxu1 }
 0xb01   : > { %v3750_v34 = vpop.f32.mrb[88].mxu0  ;;  %v3895_v35 = vsel %vm1164_vm1, %v3796_v33, 0.0  ;;  %v4889_v36 = vpop.f32.mrb[89].mxu1 }
 0xb02   : > { %v3894_v37 = vsel %vm1164_vm1, %v3750_v34, 0.0  ;;  %v4883_v38 = vpop.f32.mrb[89].mxu0  ;;  %v3799_v39 = vpop.f32.mrb[90].mxu1 }
 0xb03   : > { %v3896_v40 = vadd.f32 %v3895_v35, %v3894_v37  ;;  %v3753_v41 = vpop.f32.mrb[90].mxu0  ;;  %v4890_v42 = vpop.f32.mrb[91].mxu1 }
 0xb04   : > { %v4884_v43 = vpop.f32.mrb[91].mxu0  ;;  %v4433_v42 = vld [vmem:[%s5963_s4] ss:$0 sm:$0xff] }
 0xb08   : > { %v3888_v44 = vpop.f32.mrb[92].mxu1 }
 0xb09   : > { %v3842_v45 = vpop.f32.mrb[92].mxu0  ;;  %v4901_v46 = vpop.f32.mrb[93].mxu1  ;;  %v3899_v57 = vsel %vm1164_vm1, %v3888_v44, 0.0  ;;  %v4434_v44 = vld [vmem:[%s5375_s21] ss:$0 sm:$0xff] }
 0xb0a   : > { %v3897_v49 = vsel %vm1164_vm1, %v3842_v45, 0.0  ;;  %v4895_v50 = vpop.f32.mrb[93].mxu0  ;;  %v3891_v51 = vpop.f32.mrb[94].mxu1 }
 0xb0b   : > { %v3898_v52 = vadd.f32 %v3897_v49, %v3896_v40  ;;  %v3845_v53 = vpop.f32.mrb[94].mxu0  ;;  %v4902_v56 = vpop.f32.mrb[95].mxu1 }
 0xb0c   : > { %v4896_v48 = vpop.f32.mrb[95].mxu0 }
 0xb0d   : > { %v3900_v58 = vadd.f32 %v3899_v57, %v3898_v52 }
 0xb0f   : > { %v3907_v59 = vadd.f32 %v4420_v47, %v3900_v58 }
 0xb11   : > { %v3908_v60 = vadd.f32 %v3907_v59, %v5652_v10  ;;  %v5061_v10 = vld [vmem:[%s5959_s3] sm:$0xff]   ;;  %s1029_s3 = scalar_lea.vmem [#allocation2], %s4291_s6  ;;  %s5107_s6 = sshll.u32 %s5216_s28, 4  ;;  %s5108_s6 = int_to_ptr.vmem [resolvable:$false] %s5107_s6 }
 0xb12   : > { %4912 = vmatpush3.bf16.msra.mxu1 %v5061_v10  ;;  %s4136_s8 = sshll.u32 %s1029_s3, 4  ;;  %s5109_s4 = scalar_lea.vmem %s5108_s6, 256  ;;  %s5858_s8 = int_to_ptr.vmem [resolvable:$true] %s4136_s8 }
 0xb13   : > { %v3911_v61 = vsel %vm1164_vm1, %v3908_v60, 0.0  ;;  %4913 = vmatprep.subr.bf16.mxu1 %v5214_v1  ;;  %s5103_s12 = scalar_lea.vmem %s5858_s8, 128  ;;  %p5110_p1 = scmp.lt.s32.totalorder %s5858_s8, %s5108_s6 }
 0xb14   : > { %3912 = vadd.xlane.f32.xlu0 %v3911_v61  ;;  %p5104_p12 = scmp.ne.s32.totalorder %s5858_s8, %s5103_s12  ;;  %p5111_p2 = scmp.lt.s32.totalorder %s5109_s4, %s5103_s12 }
 0xb16   : > { %4914 = vmatpush3.bf16.msra.mxu1 %v5062_v3  ;;  %p5105_p13 = pnand %p5104_p12, %p5422_p4  ;;  %p5112_p3 = por %p5111_p2, %p5110_p1 }
 0xb17   : > { %4915 = vmatprep.subr.bf16.mxu1 %v5214_v1 }
 0xb18   : > { %p5106_p0 = pneg %p5105_p13 }
 0xb1a   : > { %4916 = vmatpush3.bf16.msra.mxu1 %v5063_v16  ;;  %p5113_p5 = pnand %p5112_p3, %p5106_p0 }
 0xb1b   : > { %4917 = vmatprep.subr.bf16.mxu1 %v5214_v1 }
 0xb1e   : > { %4918 = vmatpush3.bf16.msra.mxu1 %v5064_v17 }
 0xba1   : > { %v3913_v55 = vpop.xlane.xlu0 %3912 }
 0xba2   : > { %v3914_v54 = vmul.f32 0.03125, %v3913_v55 }
 0xba4   : > { %v3915_v62 = vsub.f32 %v3908_v60, %v3914_v54 }
 0xba6   : > { %v3916_v63 = vmul.f32 %v3915_v62, %v3915_v62 }
 0xba8   : > { %v3917_v0 = vsel %vm1164_vm1, %v3916_v63, 0.0 }
 0xba9   : > { %3918 = vadd.xlane.f32.xlu1 %v3917_v0 }
 0xc36   : > { %v3919_v4 = vpop.xlane.xlu1 %3918 }
 0xc37   : > { %v3920_v5 = vmul.f32 0.03125, %v3919_v4 }
 0xc39   : > { %v3921_v7 = vadd.f32 1e-12, %v3920_v5 }
 0xc3b   : > { %5099 = vrsqrt.f32 %v3921_v7 }
 0xc45   : > { %v5100_v8 = vpop.eup %5099 }
 0xc46   : > { %v3923_v11 = vmul.f32 %v5100_v8, %v3915_v62 }
 0xc48   : > { %v3930_v13 = vmul.f32 %v4421_v9, %v3923_v11 }
 0xc4a   : > { %v3937_v14 = vadd.f32 %v4422_v12, %v3930_v13 }
 0xc4c   : > { %v3938_v15 = vpack.c.bf16 %v3937_v14, %v3937_v14 }
 0xc4e   : > { %4908 = vmatmul.mubr.msk.bf16.vlgmr.msra.gmra.mrb[96].mxu0 %vm1164_vm1, %v3938_v15 }
 0xd21   : > { %v3999_v19 = vpop.f32.mrb[96].mxu0 }
 0xd22   : > { %v4000_v20 = vadd.f32 %v4423_v18, %v3999_v19  ;;  %v4909_v21 = vpop.f32.mrb[97].mxu0 }
 0xd23   : > { %v4002_v22 = vpop.f32.mrb[98].mxu0 }
 0xd24   : > { %v4005_v23 = vmax.f32 %v4000_v20, 0.0  ;;  %v4910_v24 = vpop.f32.mrb[99].mxu0 }
 0xd26   : > { %v4006_v25 = vpack.c.bf16 %v4005_v23, %v4005_v23 }
 0xd28   : > { %4920 = vmatmul.mubr.msk.bf16.vlgmr.msra.gmra.mrb[96].mxu1 %vm4046_vm4, %v4006_v25 }
 0xdfb   : > { %v4084_v27 = vpop.f32.mrb[96].mxu1 }
 0xdfc   : > { %v4085_v28 = vadd.f32 %v4427_v26, %v4084_v27  ;;  %v4921_v29 = vpop.f32.mrb[97].mxu1 }
 0xdfd   : > { %v4087_v30 = vpop.f32.mrb[98].mxu1 }
 0xdfe   : > { %v4922_v31 = vpop.f32.mrb[99].mxu1  ;;  %v4090_v1 = vadd.f32 %v4085_v28, %v3937_v14 }
 0xe00   : > { %v4093_v32 = vsel %vm1164_vm1, %v4090_v1, 0.0 }
 0xe01   : > { %4094 = vadd.xlane.f32.xlu0 %v4093_v32 }
 0xe8e   : > { %v4095_v33 = vpop.xlane.xlu0 %4094 }
 0xe8f   : > { %v4096_v34 = vmul.f32 0.03125, %v4095_v33 }
 0xe91   : > { %v4097_v35 = vsub.f32 %v4090_v1, %v4096_v34 }
 0xe93   : > { %v4098_v36 = vmul.f32 %v4097_v35, %v4097_v35 }
 0xe95   : > { %v4099_v37 = vsel %vm1164_vm1, %v4098_v36, 0.0 }
 0xe96   : > { %4100 = vadd.xlane.f32.xlu1 %v4099_v37 }
 0xf23   : > { %v4101_v38 = vpop.xlane.xlu1 %4100 }
 0xf24   : > { %v4102_v39 = vmul.f32 0.03125, %v4101_v38 }
 0xf26   : > { %v4103_v40 = vadd.f32 1e-12, %v4102_v39 }
 0xf28   : > { %5101 = vrsqrt.f32 %v4103_v40 }
 0xf32   : > { %v5102_v41 = vpop.eup %5101 }
 0xf33   : > { %v4105_v43 = vmul.f32 %v5102_v41, %v4097_v35 }
 0xf35   : > { %v4112_v45 = vmul.f32 %v4433_v42, %v4105_v43 }
 0xf37   : > { %v4119_v46 = vadd.f32 %v4434_v44, %v4112_v45 }
 0xf39   : > { %4120 = vst.msk [vmem:[%s1029_s3] sm:$0xff] %vm1164_vm1, %v4119_v46 }
 0xf3a   : > { %5116 = shalt.err (!%p5113_p5)
}
 0xf3b   : > { %s5117_s3 = scalar_lea.hbm %s5856_s9, 128  ;;  %s5121_s0 = scalar_lea.hbm %s5964_s7, 256 }
 0xf3c   : > { %p5118_p6 = scmp.ne.s32.totalorder %s5856_s9, %s5117_s3  ;;  %p5122_p10 = scmp.lt.u32.totalorder %s5856_s9, %s5964_s7 }
 0xf3d   : > { %p5123_p11 = scmp.lt.u32.totalorder %s5121_s0, %s5117_s3  ;;  %p5125_p13 = scmp.lt.u32.totalorder %s5117_s3, %s5856_s9 }
 0xf3e   : > { %p5119_p7 = pnand %p5118_p6, %p5422_p4 }
 0xf3f   : > { %p5124_p12 = por %p5123_p11, %p5122_p10 }
 0xf40   : > { %p5120_p9 = pneg %p5119_p7 }
 0xf41   : > { %p5126_p1 = por %p5125_p13, %p5124_p12 }
 0xf43   : > { %p5127_p0 = pnand %p5126_p1, %p5120_p9 }
 0xf45   : > { %5130 = shalt.err (!%p5127_p0)
}
 0xf46   : > { %4923 = dma.vmem_to_hbm [thread:$0]  (%p5422_p4), %s5858_s8, 128, %s5856_s9, %s4122_s11  }
 0xf47 PF: > { %p4929_p2 = scmp.ge.s32.totalorder %s5181_s2, 2  ;;  %s4148_s12 = sand.u32 1, %s5161_s22  }
 0xf48   : > { %s4149_s4 = scalar_lea.sflag [#allocation3], %s4148_s12 }
 0xf49   : > { %p4926_p3 = pnand %p4929_p2, %p5429_p8 }
 0xf4b   : > { %5156 = dma.done.wait (!%p4926_p3), %s4149_s4, 128  }
 0xf4c   : > { %5158 = vsyncadd (!%p4926_p3), %s4149_s4, 4294967168  ;;  %s76_s2 = sadd.s32 1, %s5181_s2   ;;  %s5965_s22 = smov %s5165_s23 }
 0xf4d   : > { %p73_p5 = scmp.ge.s32.totalorder %s76_s2, 4   ;;  %s5966_s23 = smov %s5169_s26 }
 0xf4e   : > { %s5967_s26 = smov %s5435_s13  ;;  %s5968_s28 = smov %s5177_s1 }
 0xf4f   : > { %s5969_s1 = smov %s5971_s10  ;;  %75 = sbr.rel (!%p73_p5) target bundleno = 65 (0x41), region = 222 }
 0xf56   :  { %4154 = vsyncpa [#allocation3], 1 }
 0xf57   :  { %4156 = vsyncpa [#allocation3 + $0x1], 1 }

</bundles_post_ra>
